<compile_context>
chip_gen: v7x
topology: tpu7x:2x2x1
jax: 0.10.0
libtpu: 0.0.40
codegen_flags: <defaults>
</compile_context>

<pallas_src>
import functools

import jax
import jax.numpy as jnp
import numpy as np
from jax.experimental import pallas as pl
from jax.experimental.pallas import tpu as pltpu


def _round_up(x, m):
    return (x + m - 1) // m * m


# ----------------------------- Pallas kernel --------------------------------

def _direct_conv_kernel(x_ref, w_ref, b_ref, *rest, stride, Ho, Wo, relu,
                        shortcut):
    """Direct 3x3 conv (pad=1) + folded BN [+ fused shortcut] [+ ReLU].

    x_ref : (s*s, Hq, Wq, Cin)  phase-split, spatially padded image (one image)
    w_ref : (9, Cin, Cout)      conv weights, BN scale folded, bf16
    b_ref : (1, Cout)           f32 bias (BN shift; + projection BN shift)
    rest  : (o_ref,)                              shortcut is None
            (r_ref, o_ref)                        shortcut == "identity"
            (rx_ref, rw_ref, o_ref)               shortcut == "proj"
    """
    s = stride
    Cout = w_ref.shape[-1]
    M = Ho * Wo

    if shortcut == "proj":
        rx_ref, rw_ref, o_ref = rest
        rx = rx_ref[0].reshape(M, rx_ref.shape[-1])
        acc = jnp.dot(rx, rw_ref[...], preferred_element_type=jnp.float32)
    elif shortcut == "identity":
        r_ref, o_ref = rest
        acc = jnp.zeros((M, Cout), jnp.float32)
    else:
        (o_ref,) = rest
        acc = jnp.zeros((M, Cout), jnp.float32)

    # 9 shifted matmuls == direct 3x3 convolution on the phase-split padded input.
    for kh in range(3):
        for kw in range(3):
            p = (kh % s) * s + (kw % s)       # phase index
            dh, dw = kh // s, kw // s         # shift inside that phase tensor
            xs = x_ref[p, dh:dh + Ho, dw:dw + Wo, :]          # (Ho, Wo, Cin)
            acc = acc + jnp.dot(xs.reshape(M, xs.shape[-1]),
                                w_ref[kh * 3 + kw],
                                preferred_element_type=jnp.float32)

    acc = acc + b_ref[...]                    # (1, Cout) broadcasts over (M, Cout)
    if shortcut == "identity":
        acc = acc + r_ref[0].reshape(M, Cout).astype(jnp.float32)
    if relu:
        acc = jnp.maximum(acc, 0.0)
    o_ref[0] = acc.reshape(Ho, Wo, Cout).astype(o_ref.dtype)


# ----------------------------- Pallas wrapper -------------------------------

def _phase_split_padded(x_nhwc, stride, compute_dtype):
    """Pad (3x3, pad=1) input and split into stride^2 spatial phases.

    Returns (xph, Hq, Wq) with xph of shape (N * s*s, Hq, Wq, C); phase
    p = ph*s + pw of image n holds x_pad[n, ph::s, pw::s, :], so the padded
    pixel (s*oh + kh, s*ow + kw) is xph[n*s*s + (kh%s)*s + (kw%s),
    oh + kh//s, ow + kw//s, :].  For s == 1 this is just the padded image.
    """
    x = x_nhwc.astype(compute_dtype)
    xpad = jnp.pad(x, ((0, 0), (1, 1), (1, 1), (0, 0)))
    N, Hp, Wp, C = xpad.shape
    s = stride
    if s == 1:
        return xpad, Hp, Wp
    Hp2, Wp2 = _round_up(Hp, s), _round_up(Wp, s)
    xpad = jnp.pad(xpad, ((0, 0), (0, Hp2 - Hp), (0, Wp2 - Wp), (0, 0)))
    Hq, Wq = Hp2 // s, Wp2 // s
    xph = xpad.reshape(N, Hq, s, Wq, s, C).transpose(0, 2, 4, 1, 3, 5)
    return xph.reshape(N * s * s, Hq, Wq, C), Hq, Wq


def conv3x3_bn_act(x_nhwc, w9, bias, *, stride=1, relu=True,
                   out_dtype=jnp.bfloat16, identity_res=None,
                   proj_x=None, proj_w=None, compute_dtype=jnp.bfloat16):
    """Fused 3x3 conv (pad=1) + BN (folded into w9/bias) [+ shortcut] [+ ReLU].

    w9: (9, Cin, Cout) BN-scale-folded weights.  bias: (1, Cout) f32 (with the
    projection shortcut's BN bias pre-added when proj_* are given).
    identity_res: (N, Ho, Wo, Cout) identity shortcut, added in the epilogue.
    proj_x/proj_w: strided input (N, Ho, Wo, Cin0) + folded 1x1 weights
    (Cin0, Cout) of the projection shortcut, fused as one extra matmul.
    """
    N, H, W, Cin = x_nhwc.shape
    Cout = w9.shape[-1]
    s = stride
    Ho = (H + 2 - 3) // s + 1
    Wo = (W + 2 - 3) // s + 1

    xph, Hq, Wq = _phase_split_padded(x_nhwc, s, compute_dtype)

    in_specs = [
        pl.BlockSpec((s * s, Hq, Wq, Cin), lambda n: (n, 0, 0, 0)),
        pl.BlockSpec((9, Cin, Cout), lambda n: (0, 0, 0)),
        pl.BlockSpec((1, Cout), lambda n: (0, 0)),
    ]
    args = [xph, w9.astype(compute_dtype), bias.astype(jnp.float32)]

    if proj_x is not None:
        shortcut = "proj"
        Cin0 = proj_x.shape[-1]
        in_specs += [
            pl.BlockSpec((1, Ho, Wo, Cin0), lambda n: (n, 0, 0, 0)),
            pl.BlockSpec((Cin0, Cout), lambda n: (0, 0)),
        ]
        args += [proj_x.astype(compute_dtype), proj_w.astype(compute_dtype)]
    elif identity_res is not None:
        shortcut = "identity"
        in_specs += [pl.BlockSpec((1, Ho, Wo, Cout), lambda n: (n, 0, 0, 0))]
        args += [identity_res.astype(compute_dtype)]
    else:
        shortcut = None

    kernel = functools.partial(_direct_conv_kernel, stride=s, Ho=Ho, Wo=Wo,
                               relu=relu, shortcut=shortcut)

    flops = 2 * N * Ho * Wo * 9 * Cin * Cout
    if proj_x is not None:
        flops += 2 * N * Ho * Wo * proj_x.shape[-1] * Cout
    bytes_accessed = (sum(int(np.prod(a.shape)) * a.dtype.itemsize for a in args)
                      + N * Ho * Wo * Cout * jnp.dtype(out_dtype).itemsize)

    return pl.pallas_call(
        kernel,
        grid=(N,),
        in_specs=in_specs,
        out_specs=pl.BlockSpec((1, Ho, Wo, Cout), lambda n: (n, 0, 0, 0)),
        out_shape=jax.ShapeDtypeStruct((N, Ho, Wo, Cout), out_dtype),
        compiler_params=pltpu.CompilerParams(
            dimension_semantics=("parallel",),
            vmem_limit_bytes=32 * 1024 * 1024),
        cost_estimate=pl.CostEstimate(flops=flops, transcendentals=0,
                                      bytes_accessed=int(bytes_accessed)),
    )(*args)


# ----------------------- hoisted weight preparation --------------------------

def _fold_bn(w, bn, eps=1e-5):
    """Fold eval-mode BN into weights whose last dim is Cout; return (w, bias)."""
    scale = bn["gamma"] / jnp.sqrt(bn["var"] + eps)
    bias = bn["beta"] - bn["mean"] * scale
    return w * scale, bias


def prepare_block_params(params, eps=1e-5, compute_dtype=jnp.bfloat16):
    """One-time weight prep (hoisted out of the forward path):
    OIHW -> (9, Cin, Cout), BN folding, bf16 cast, projection bias pre-merge."""
    def conv9(w_oihw):                       # (Cout, Cin, 3, 3) -> (9, Cin, Cout)
        cout, cin = w_oihw.shape[:2]
        return jnp.transpose(w_oihw, (2, 3, 1, 0)).reshape(9, cin, cout)

    w1, b1 = _fold_bn(conv9(params["conv1_w"]), params["bn1"], eps)
    w2, b2 = _fold_bn(conv9(params["conv2_w"]), params["bn2"], eps)
    prep = {
        "w1": w1.astype(compute_dtype),
        "b1": b1.reshape(1, -1).astype(jnp.float32),
        "w2": w2.astype(compute_dtype),
    }
    if "sc_w" in params:
        ws = jnp.transpose(params["sc_w"][:, :, 0, 0], (1, 0))   # (Cin, Cout)
        ws, bs = _fold_bn(ws, params["bn_sc"], eps)
        prep["w_sc"] = ws.astype(compute_dtype)
        b2 = b2 + bs          # pre-add projection BN bias -> no extra kernel input
    prep["b2"] = b2.reshape(1, -1).astype(jnp.float32)
    return prep


# ----------------------------- block forward --------------------------------

@functools.partial(jax.jit, static_argnames=("stride",))
def residual_block_forward(x_nchw, prep, stride=1):
    # NCHW interface to match PyTorch; in a full network keep NHWC end-to-end
    # and drop this per-block entry/exit transpose.
    x = jnp.transpose(x_nchw, (0, 2, 3, 1))           # NHWC, f32
    xb = x.astype(jnp.bfloat16)                        # single bf16 cast of x

    # conv1: 3x3(stride) + BN + ReLU, bf16 activation writeback
    y1 = conv3x3_bn_act(xb, prep["w1"], prep["b1"], stride=stride, relu=True,
                        out_dtype=jnp.bfloat16)

    # conv2: 3x3(1) + BN, fused shortcut + final ReLU, f32 output
    if "w_sc" in prep:
        # projection shortcut (conv1x1 stride s + BN), fused into the conv2 kernel
        proj_x = xb[:, ::stride, ::stride, :]
        y2 = conv3x3_bn_act(y1, prep["w2"], prep["b2"], stride=1, relu=True,
                            out_dtype=jnp.float32,
                            proj_x=proj_x, proj_w=prep["w_sc"])
    else:
        # identity shortcut: streamed in bf16, added in the f32 epilogue
        y2 = conv3x3_bn_act(y1, prep["w2"], prep["b2"], stride=1, relu=True,
                            out_dtype=jnp.float32, identity_res=xb)

    return jnp.transpose(y2, (0, 3, 1, 2))             # back to NCHW


# ------------------------ pure-JAX reference (check) ------------------------

def ref_forward(x, params, stride, has_shortcut):
    def conv(x, w, s, pad):
        return jax.lax.conv_general_dilated(
            x, w, (s, s), [(pad, pad), (pad, pad)],
            dimension_numbers=("NCHW", "OIHW", "NCHW"))

    def bn(x, p):
        s = p["gamma"] / jnp.sqrt(p["var"] + 1e-5)
        b = p["beta"] - p["mean"] * s
        return x * s[None, :, None, None] + b[None, :, None, None]

    left = jax.nn.relu(bn(conv(x, params["conv1_w"], stride, 1), params["bn1"]))
    left = bn(conv(left, params["conv2_w"], 1, 1), params["bn2"])
    if has_shortcut:
        sc = bn(conv(x, params["sc_w"], stride, 0), params["bn_sc"])
    else:
        sc = x
    return jax.nn.relu(left + sc)


# ----------------------------------- main -----------------------------------

def make_params(key, inchannel, outchannel, has_shortcut):
    ks = jax.random.split(key, 6)

    def bn_params(k):
        k1, k2, k3, k4 = jax.random.split(k, 4)
        return {
            "gamma": 1.0 + 0.1 * jax.random.normal(k1, (outchannel,), jnp.float32),
            "beta": 0.1 * jax.random.normal(k2, (outchannel,), jnp.float32),
            "mean": 0.1 * jax.random.normal(k3, (outchannel,), jnp.float32),
            "var": 0.5 + jnp.abs(jax.random.normal(k4, (outchannel,), jnp.float32)),
        }

    params = {
        "conv1_w": 0.1 * jax.random.normal(ks[0], (outchannel, inchannel, 3, 3), jnp.float32),
        "conv2_w": 0.1 * jax.random.normal(ks[1], (outchannel, outchannel, 3, 3), jnp.float32),
        "bn1": bn_params(ks[2]),
        "bn2": bn_params(ks[3]),
    }
    if has_shortcut:
        params["sc_w"] = 0.1 * jax.random.normal(ks[4], (outchannel, inchannel, 1, 1), jnp.float32)
        params["bn_sc"] = bn_params(ks[5])
    return params


if __name__ == "__main__":
    key = jax.random.PRNGKey(0)

    configs = [
        # (N, Cin, H, W, Cout, stride)
        (2, 4, 16, 16, 8, 2),   # projection shortcut (conv1x1 + BN), fused into conv2
        (2, 8, 16, 16, 8, 1),   # identity shortcut, fused residual add
    ]
    for idx, (N, Cin, H, W, Cout, stride) in enumerate(configs):
        k_x, k_p = jax.random.split(jax.random.fold_in(key, idx))
        has_shortcut = (stride != 1) or (Cin != Cout)

        x = jax.random.normal(k_x, (N, Cin, H, W), jnp.float32)
        params = make_params(k_p, Cin, Cout, has_shortcut)
        prep = prepare_block_params(params)   # hoisted: once per layer, not per call

        out = jax.block_until_ready(residual_block_forward(x, prep, stride=stride))
        ref = jax.block_until_ready(ref_forward(x, params, stride, has_shortcut))

        # bf16 MXU inputs / bf16 residual stream (f32 accumulation) -> loosened tol.
        np.testing.assert_allclose(np.asarray(out), np.asarray(ref),
                                   rtol=5e-2, atol=5e-2)

    print("KERNEL_OK")
</pallas_src>

<mosaic_0001>
module attributes {stable_mosaic.version = 11 : i64} {
  func.func @_direct_conv_kernel(%arg0: i32, %arg1: memref<4x9x9x4xbf16, #tpu.memory_space<vmem>>, %arg2: memref<9x4x8xbf16, #tpu.memory_space<vmem>>, %arg3: memref<1x8xf32, #tpu.memory_space<vmem>>, %arg4: memref<1x8x8x8xbf16, #tpu.memory_space<vmem>>) attributes {dimension_semantics = [#tpu.dimension_semantics<parallel>], iteration_bounds = array<i64: 2>, scalar_prefetch = 0 : i64, scratch_operands = 0 : i64, tpu.core_type = #tpu.core_type<tc>, window_params = [{transform_indices = @transform_0, window_bounds = array<i64: 4, 9, 9, 4>}, {pipeline_mode = #tpu.pipeline_mode<synchronous>, transform_indices = @transform_1, window_bounds = array<i64: 9, 4, 8>}, {pipeline_mode = #tpu.pipeline_mode<synchronous>, transform_indices = @transform_2, window_bounds = array<i64: 1, 8>}, {transform_indices = @transform_3, window_bounds = array<i64: 1, 8, 8, 8>}]} {
    %cst = arith.constant 0.000000e+00 : f32
    %0 = vector.broadcast %cst : f32 to vector<64x8xf32>
    %c0 = arith.constant 0 : index
    %c0_0 = arith.constant 0 : index
    %c0_1 = arith.constant 0 : index
    %c0_2 = arith.constant 0 : index
    %1 = vector.load %arg1[%c0, %c0_0, %c0_1, %c0_2] : memref<4x9x9x4xbf16, #tpu.memory_space<vmem>>, vector<1x8x8x4xbf16>
    %2 = vector.shape_cast %1 : vector<1x8x8x4xbf16> to vector<8x8x4xbf16>
    %3 = vector.shape_cast %2 : vector<8x8x4xbf16> to vector<64x4xbf16>
    %c0_3 = arith.constant 0 : index
    %c0_4 = arith.constant 0 : index
    %c0_5 = arith.constant 0 : index
    %4 = vector.load %arg2[%c0_3, %c0_4, %c0_5] : memref<9x4x8xbf16, #tpu.memory_space<vmem>>, vector<1x4x8xbf16>
    %5 = vector.shape_cast %4 : vector<1x4x8xbf16> to vector<4x8xbf16>
    %cst_6 = arith.constant dense<0.000000e+00> : vector<64x8xf32>
    %6 = tpu.matmul %3, %5, %cst_6 {dimension_numbers = #tpu.dot_dimension_numbers<[1], [0], [0], [1], [0, 0, 1, 1], [], []>} : vector<64x4xbf16>, vector<4x8xbf16>, vector<64x8xf32> -> vector<64x8xf32>
    %7 = arith.addf %0, %6 : vector<64x8xf32>
    %c1 = arith.constant 1 : index
    %c0_7 = arith.constant 0 : index
    %c0_8 = arith.constant 0 : index
    %c0_9 = arith.constant 0 : index
    %8 = vector.load %arg1[%c1, %c0_7, %c0_8, %c0_9] : memref<4x9x9x4xbf16, #tpu.memory_space<vmem>>, vector<1x8x8x4xbf16>
    %9 = vector.shape_cast %8 : vector<1x8x8x4xbf16> to vector<8x8x4xbf16>
    %10 = vector.shape_cast %9 : vector<8x8x4xbf16> to vector<64x4xbf16>
    %c1_10 = arith.constant 1 : index
    %c0_11 = arith.constant 0 : index
    %c0_12 = arith.constant 0 : index
    %11 = vector.load %arg2[%c1_10, %c0_11, %c0_12] : memref<9x4x8xbf16, #tpu.memory_space<vmem>>, vector<1x4x8xbf16>
    %12 = vector.shape_cast %11 : vector<1x4x8xbf16> to vector<4x8xbf16>
    %cst_13 = arith.constant dense<0.000000e+00> : vector<64x8xf32>
    %13 = tpu.matmul %10, %12, %cst_13 {dimension_numbers = #tpu.dot_dimension_numbers<[1], [0], [0], [1], [0, 0, 1, 1], [], []>} : vector<64x4xbf16>, vector<4x8xbf16>, vector<64x8xf32> -> vector<64x8xf32>
    %14 = arith.addf %7, %13 : vector<64x8xf32>
    %c0_14 = arith.constant 0 : index
    %c0_15 = arith.constant 0 : index
    %c1_16 = arith.constant 1 : index
    %c0_17 = arith.constant 0 : index
    %15 = vector.load %arg1[%c0_14, %c0_15, %c1_16, %c0_17] : memref<4x9x9x4xbf16, #tpu.memory_space<vmem>>, vector<1x8x8x4xbf16>
    %16 = vector.shape_cast %15 : vector<1x8x8x4xbf16> to vector<8x8x4xbf16>
    %17 = vector.shape_cast %16 : vector<8x8x4xbf16> to vector<64x4xbf16>
    %c2 = arith.constant 2 : index
    %c0_18 = arith.constant 0 : index
    %c0_19 = arith.constant 0 : index
    %18 = vector.load %arg2[%c2, %c0_18, %c0_19] : memref<9x4x8xbf16, #tpu.memory_space<vmem>>, vector<1x4x8xbf16>
    %19 = vector.shape_cast %18 : vector<1x4x8xbf16> to vector<4x8xbf16>
    %cst_20 = arith.constant dense<0.000000e+00> : vector<64x8xf32>
    %20 = tpu.matmul %17, %19, %cst_20 {dimension_numbers = #tpu.dot_dimension_numbers<[1], [0], [0], [1], [0, 0, 1, 1], [], []>} : vector<64x4xbf16>, vector<4x8xbf16>, vector<64x8xf32> -> vector<64x8xf32>
    %21 = arith.addf %14, %20 : vector<64x8xf32>
    %c2_21 = arith.constant 2 : index
    %c0_22 = arith.constant 0 : index
    %c0_23 = arith.constant 0 : index
    %c0_24 = arith.constant 0 : index
    %22 = vector.load %arg1[%c2_21, %c0_22, %c0_23, %c0_24] : memref<4x9x9x4xbf16, #tpu.memory_space<vmem>>, vector<1x8x8x4xbf16>
    %23 = vector.shape_cast %22 : vector<1x8x8x4xbf16> to vector<8x8x4xbf16>
    %24 = vector.shape_cast %23 : vector<8x8x4xbf16> to vector<64x4xbf16>
    %c3 = arith.constant 3 : index
    %c0_25 = arith.constant 0 : index
    %c0_26 = arith.constant 0 : index
    %25 = vector.load %arg2[%c3, %c0_25, %c0_26] : memref<9x4x8xbf16, #tpu.memory_space<vmem>>, vector<1x4x8xbf16>
    %26 = vector.shape_cast %25 : vector<1x4x8xbf16> to vector<4x8xbf16>
    %cst_27 = arith.constant dense<0.000000e+00> : vector<64x8xf32>
    %27 = tpu.matmul %24, %26, %cst_27 {dimension_numbers = #tpu.dot_dimension_numbers<[1], [0], [0], [1], [0, 0, 1, 1], [], []>} : vector<64x4xbf16>, vector<4x8xbf16>, vector<64x8xf32> -> vector<64x8xf32>
    %28 = arith.addf %21, %27 : vector<64x8xf32>
    %c3_28 = arith.constant 3 : index
    %c0_29 = arith.constant 0 : index
    %c0_30 = arith.constant 0 : index
    %c0_31 = arith.constant 0 : index
    %29 = vector.load %arg1[%c3_28, %c0_29, %c0_30, %c0_31] : memref<4x9x9x4xbf16, #tpu.memory_space<vmem>>, vector<1x8x8x4xbf16>
    %30 = vector.shape_cast %29 : vector<1x8x8x4xbf16> to vector<8x8x4xbf16>
    %31 = vector.shape_cast %30 : vector<8x8x4xbf16> to vector<64x4xbf16>
    %c4 = arith.constant 4 : index
    %c0_32 = arith.constant 0 : index
    %c0_33 = arith.constant 0 : index
    %32 = vector.load %arg2[%c4, %c0_32, %c0_33] : memref<9x4x8xbf16, #tpu.memory_space<vmem>>, vector<1x4x8xbf16>
    %33 = vector.shape_cast %32 : vector<1x4x8xbf16> to vector<4x8xbf16>
    %cst_34 = arith.constant dense<0.000000e+00> : vector<64x8xf32>
    %34 = tpu.matmul %31, %33, %cst_34 {dimension_numbers = #tpu.dot_dimension_numbers<[1], [0], [0], [1], [0, 0, 1, 1], [], []>} : vector<64x4xbf16>, vector<4x8xbf16>, vector<64x8xf32> -> vector<64x8xf32>
    %35 = arith.addf %28, %34 : vector<64x8xf32>
    %c2_35 = arith.constant 2 : index
    %c0_36 = arith.constant 0 : index
    %c1_37 = arith.constant 1 : index
    %c0_38 = arith.constant 0 : index
    %36 = vector.load %arg1[%c2_35, %c0_36, %c1_37, %c0_38] : memref<4x9x9x4xbf16, #tpu.memory_space<vmem>>, vector<1x8x8x4xbf16>
    %37 = vector.shape_cast %36 : vector<1x8x8x4xbf16> to vector<8x8x4xbf16>
    %38 = vector.shape_cast %37 : vector<8x8x4xbf16> to vector<64x4xbf16>
    %c5 = arith.constant 5 : index
    %c0_39 = arith.constant 0 : index
    %c0_40 = arith.constant 0 : index
    %39 = vector.load %arg2[%c5, %c0_39, %c0_40] : memref<9x4x8xbf16, #tpu.memory_space<vmem>>, vector<1x4x8xbf16>
    %40 = vector.shape_cast %39 : vector<1x4x8xbf16> to vector<4x8xbf16>
    %cst_41 = arith.constant dense<0.000000e+00> : vector<64x8xf32>
    %41 = tpu.matmul %38, %40, %cst_41 {dimension_numbers = #tpu.dot_dimension_numbers<[1], [0], [0], [1], [0, 0, 1, 1], [], []>} : vector<64x4xbf16>, vector<4x8xbf16>, vector<64x8xf32> -> vector<64x8xf32>
    %42 = arith.addf %35, %41 : vector<64x8xf32>
    %c0_42 = arith.constant 0 : index
    %c1_43 = arith.constant 1 : index
    %c0_44 = arith.constant 0 : index
    %c0_45 = arith.constant 0 : index
    %43 = vector.load %arg1[%c0_42, %c1_43, %c0_44, %c0_45] : memref<4x9x9x4xbf16, #tpu.memory_space<vmem>>, vector<1x8x8x4xbf16>
    %44 = vector.shape_cast %43 : vector<1x8x8x4xbf16> to vector<8x8x4xbf16>
    %45 = vector.shape_cast %44 : vector<8x8x4xbf16> to vector<64x4xbf16>
    %c6 = arith.constant 6 : index
    %c0_46 = arith.constant 0 : index
    %c0_47 = arith.constant 0 : index
    %46 = vector.load %arg2[%c6, %c0_46, %c0_47] : memref<9x4x8xbf16, #tpu.memory_space<vmem>>, vector<1x4x8xbf16>
    %47 = vector.shape_cast %46 : vector<1x4x8xbf16> to vector<4x8xbf16>
    %cst_48 = arith.constant dense<0.000000e+00> : vector<64x8xf32>
    %48 = tpu.matmul %45, %47, %cst_48 {dimension_numbers = #tpu.dot_dimension_numbers<[1], [0], [0], [1], [0, 0, 1, 1], [], []>} : vector<64x4xbf16>, vector<4x8xbf16>, vector<64x8xf32> -> vector<64x8xf32>
    %49 = arith.addf %42, %48 : vector<64x8xf32>
    %c1_49 = arith.constant 1 : index
    %c1_50 = arith.constant 1 : index
    %c0_51 = arith.constant 0 : index
    %c0_52 = arith.constant 0 : index
    %50 = vector.load %arg1[%c1_49, %c1_50, %c0_51, %c0_52] : memref<4x9x9x4xbf16, #tpu.memory_space<vmem>>, vector<1x8x8x4xbf16>
    %51 = vector.shape_cast %50 : vector<1x8x8x4xbf16> to vector<8x8x4xbf16>
    %52 = vector.shape_cast %51 : vector<8x8x4xbf16> to vector<64x4xbf16>
    %c7 = arith.constant 7 : index
    %c0_53 = arith.constant 0 : index
    %c0_54 = arith.constant 0 : index
    %53 = vector.load %arg2[%c7, %c0_53, %c0_54] : memref<9x4x8xbf16, #tpu.memory_space<vmem>>, vector<1x4x8xbf16>
    %54 = vector.shape_cast %53 : vector<1x4x8xbf16> to vector<4x8xbf16>
    %cst_55 = arith.constant dense<0.000000e+00> : vector<64x8xf32>
    %55 = tpu.matmul %52, %54, %cst_55 {dimension_numbers = #tpu.dot_dimension_numbers<[1], [0], [0], [1], [0, 0, 1, 1], [], []>} : vector<64x4xbf16>, vector<4x8xbf16>, vector<64x8xf32> -> vector<64x8xf32>
    %56 = arith.addf %49, %55 : vector<64x8xf32>
    %c0_56 = arith.constant 0 : index
    %c1_57 = arith.constant 1 : index
    %c1_58 = arith.constant 1 : index
    %c0_59 = arith.constant 0 : index
    %57 = vector.load %arg1[%c0_56, %c1_57, %c1_58, %c0_59] : memref<4x9x9x4xbf16, #tpu.memory_space<vmem>>, vector<1x8x8x4xbf16>
    %58 = vector.shape_cast %57 : vector<1x8x8x4xbf16> to vector<8x8x4xbf16>
    %59 = vector.shape_cast %58 : vector<8x8x4xbf16> to vector<64x4xbf16>
    %c8 = arith.constant 8 : index
    %c0_60 = arith.constant 0 : index
    %c0_61 = arith.constant 0 : index
    %60 = vector.load %arg2[%c8, %c0_60, %c0_61] : memref<9x4x8xbf16, #tpu.memory_space<vmem>>, vector<1x4x8xbf16>
    %61 = vector.shape_cast %60 : vector<1x4x8xbf16> to vector<4x8xbf16>
    %cst_62 = arith.constant dense<0.000000e+00> : vector<64x8xf32>
    %62 = tpu.matmul %59, %61, %cst_62 {dimension_numbers = #tpu.dot_dimension_numbers<[1], [0], [0], [1], [0, 0, 1, 1], [], []>} : vector<64x4xbf16>, vector<4x8xbf16>, vector<64x8xf32> -> vector<64x8xf32>
    %63 = arith.addf %56, %62 : vector<64x8xf32>
    %c0_63 = arith.constant 0 : index
    %c0_64 = arith.constant 0 : index
    %64 = vector.load %arg3[%c0_63, %c0_64] : memref<1x8xf32, #tpu.memory_space<vmem>>, vector<1x8xf32>
    %65 = vector.broadcast %64 : vector<1x8xf32> to vector<64x8xf32>
    %66 = arith.addf %63, %65 : vector<64x8xf32>
    %cst_65 = arith.constant 0.000000e+00 : f32
    %67 = vector.broadcast %cst_65 : f32 to vector<64x8xf32>
    %68 = arith.maximumf %66, %67 : vector<64x8xf32>
    %69 = vector.shape_cast %68 : vector<64x8xf32> to vector<8x8x8xf32>
    %70 = arith.truncf %69 : vector<8x8x8xf32> to vector<8x8x8xbf16>
    %c0_66 = arith.constant 0 : index
    %c0_67 = arith.constant 0 : index
    %c0_68 = arith.constant 0 : index
    %c0_69 = arith.constant 0 : index
    %71 = vector.load %arg4[%c0_66, %c0_67, %c0_68, %c0_69] : memref<1x8x8x8xbf16, #tpu.memory_space<vmem>>, vector<1x8x8x8xbf16>
    %72 = vector.shape_cast %71 : vector<1x8x8x8xbf16> to vector<8x8x8xbf16>
    %73 = vector.shape_cast %70 : vector<8x8x8xbf16> to vector<1x8x8x8xbf16>
    tpu.vector_store %arg4[%c0_66, %c0_67, %c0_68, %c0_69], %73 {strides = array<i32>} : memref<1x8x8x8xbf16, #tpu.memory_space<vmem>>, vector<1x8x8x8xbf16>,
    return
  }
  func.func @transform_0(%arg0: i32) -> (i32, i32, i32, i32) {
    %c0_i32 = arith.constant 0 : i32
    %c0_i32_0 = arith.constant 0 : i32
    %c0_i32_1 = arith.constant 0 : i32
    %c0_i32_2 = arith.constant 0 : i32
    return %arg0, %c0_i32, %c0_i32_0, %c0_i32_1 : i32, i32, i32, i32
  }
  func.func @transform_1(%arg0: i32) -> (i32, i32, i32) {
    %c0_i32 = arith.constant 0 : i32
    %c0_i32_0 = arith.constant 0 : i32
    %c0_i32_1 = arith.constant 0 : i32
    %c0_i32_2 = arith.constant 0 : i32
    return %c0_i32, %c0_i32_0, %c0_i32_1 : i32, i32, i32
  }
  func.func @transform_2(%arg0: i32) -> (i32, i32) {
    %c0_i32 = arith.constant 0 : i32
    %c0_i32_0 = arith.constant 0 : i32
    %c0_i32_1 = arith.constant 0 : i32
    return %c0_i32, %c0_i32_0 : i32, i32
  }
  func.func @transform_3(%arg0: i32) -> (i32, i32, i32, i32) {
    %c0_i32 = arith.constant 0 : i32
    %c0_i32_0 = arith.constant 0 : i32
    %c0_i32_1 = arith.constant 0 : i32
    %c0_i32_2 = arith.constant 0 : i32
    return %arg0, %c0_i32, %c0_i32_0, %c0_i32_1 : i32, i32, i32, i32
  }
}

module attributes {stable_mosaic.version = 11 : i64} {
  func.func @_direct_conv_kernel(%arg0: i32, %arg1: memref<1x10x10x8xbf16, #tpu.memory_space<vmem>>, %arg2: memref<9x8x8xbf16, #tpu.memory_space<vmem>>, %arg3: memref<1x8xf32, #tpu.memory_space<vmem>>, %arg4: memref<1x8x8x4xbf16, #tpu.memory_space<vmem>>, %arg5: memref<4x8xbf16, #tpu.memory_space<vmem>>, %arg6: memref<1x8x8x8xf32, #tpu.memory_space<vmem>>) attributes {dimension_semantics = [#tpu.dimension_semantics<parallel>], iteration_bounds = array<i64: 2>, scalar_prefetch = 0 : i64, scratch_operands = 0 : i64, tpu.core_type = #tpu.core_type<tc>, window_params = [{transform_indices = @transform_0, window_bounds = array<i64: 1, 10, 10, 8>}, {pipeline_mode = #tpu.pipeline_mode<synchronous>, transform_indices = @transform_1, window_bounds = array<i64: 9, 8, 8>}, {pipeline_mode = #tpu.pipeline_mode<synchronous>, transform_indices = @transform_2, window_bounds = array<i64: 1, 8>}, {transform_indices = @transform_3, window_bounds = array<i64: 1, 8, 8, 4>}, {pipeline_mode = #tpu.pipeline_mode<synchronous>, transform_indices = @transform_4, window_bounds = array<i64: 4, 8>}, {transform_indices = @transform_5, window_bounds = array<i64: 1, 8, 8, 8>}]} {
    %c0 = arith.constant 0 : index
    %c0_0 = arith.constant 0 : index
    %c0_1 = arith.constant 0 : index
    %c0_2 = arith.constant 0 : index
    %0 = vector.load %arg4[%c0, %c0_0, %c0_1, %c0_2] : memref<1x8x8x4xbf16, #tpu.memory_space<vmem>>, vector<1x8x8x4xbf16>
    %1 = vector.shape_cast %0 : vector<1x8x8x4xbf16> to vector<8x8x4xbf16>
    %2 = vector.shape_cast %1 : vector<8x8x4xbf16> to vector<64x4xbf16>
    %c0_3 = arith.constant 0 : index
    %c0_4 = arith.constant 0 : index
    %3 = vector.load %arg5[%c0_3, %c0_4] : memref<4x8xbf16, #tpu.memory_space<vmem>>, vector<4x8xbf16>
    %cst = arith.constant dense<0.000000e+00> : vector<64x8xf32>
    %4 = tpu.matmul %2, %3, %cst {dimension_numbers = #tpu.dot_dimension_numbers<[1], [0], [0], [1], [0, 0, 1, 1], [], []>} : vector<64x4xbf16>, vector<4x8xbf16>, vector<64x8xf32> -> vector<64x8xf32>
    %c0_5 = arith.constant 0 : index
    %c0_6 = arith.constant 0 : index
    %c0_7 = arith.constant 0 : index
    %c0_8 = arith.constant 0 : index
    %5 = vector.load %arg1[%c0_5, %c0_6, %c0_7, %c0_8] : memref<1x10x10x8xbf16, #tpu.memory_space<vmem>>, vector<1x8x8x8xbf16>
    %6 = vector.shape_cast %5 : vector<1x8x8x8xbf16> to vector<8x8x8xbf16>
    %7 = vector.shape_cast %6 : vector<8x8x8xbf16> to vector<64x8xbf16>
    %c0_9 = arith.constant 0 : index
    %c0_10 = arith.constant 0 : index
    %c0_11 = arith.constant 0 : index
    %8 = vector.load %arg2[%c0_9, %c0_10, %c0_11] : memref<9x8x8xbf16, #tpu.memory_space<vmem>>, vector<1x8x8xbf16>
    %9 = vector.shape_cast %8 : vector<1x8x8xbf16> to vector<8x8xbf16>
    %cst_12 = arith.constant dense<0.000000e+00> : vector<64x8xf32>
    %10 = tpu.matmul %7, %9, %cst_12 {dimension_numbers = #tpu.dot_dimension_numbers<[1], [0], [0], [1], [0, 0, 1, 1], [], []>} : vector<64x8xbf16>, vector<8x8xbf16>, vector<64x8xf32> -> vector<64x8xf32>
    %11 = arith.addf %4, %10 : vector<64x8xf32>
    %c0_13 = arith.constant 0 : index
    %c0_14 = arith.constant 0 : index
    %c1 = arith.constant 1 : index
    %c0_15 = arith.constant 0 : index
    %12 = vector.load %arg1[%c0_13, %c0_14, %c1, %c0_15] : memref<1x10x10x8xbf16, #tpu.memory_space<vmem>>, vector<1x8x8x8xbf16>
    %13 = vector.shape_cast %12 : vector<1x8x8x8xbf16> to vector<8x8x8xbf16>
    %14 = vector.shape_cast %13 : vector<8x8x8xbf16> to vector<64x8xbf16>
    %c1_16 = arith.constant 1 : index
    %c0_17 = arith.constant 0 : index
    %c0_18 = arith.constant 0 : index
    %15 = vector.load %arg2[%c1_16, %c0_17, %c0_18] : memref<9x8x8xbf16, #tpu.memory_space<vmem>>, vector<1x8x8xbf16>
    %16 = vector.shape_cast %15 : vector<1x8x8xbf16> to vector<8x8xbf16>
    %cst_19 = arith.constant dense<0.000000e+00> : vector<64x8xf32>
    %17 = tpu.matmul %14, %16, %cst_19 {dimension_numbers = #tpu.dot_dimension_numbers<[1], [0], [0], [1], [0, 0, 1, 1], [], []>} : vector<64x8xbf16>, vector<8x8xbf16>, vector<64x8xf32> -> vector<64x8xf32>
    %18 = arith.addf %11, %17 : vector<64x8xf32>
    %c0_20 = arith.constant 0 : index
    %c0_21 = arith.constant 0 : index
    %c2 = arith.constant 2 : index
    %c0_22 = arith.constant 0 : index
    %19 = vector.load %arg1[%c0_20, %c0_21, %c2, %c0_22] : memref<1x10x10x8xbf16, #tpu.memory_space<vmem>>, vector<1x8x8x8xbf16>
    %20 = vector.shape_cast %19 : vector<1x8x8x8xbf16> to vector<8x8x8xbf16>
    %21 = vector.shape_cast %20 : vector<8x8x8xbf16> to vector<64x8xbf16>
    %c2_23 = arith.constant 2 : index
    %c0_24 = arith.constant 0 : index
    %c0_25 = arith.constant 0 : index
    %22 = vector.load %arg2[%c2_23, %c0_24, %c0_25] : memref<9x8x8xbf16, #tpu.memory_space<vmem>>, vector<1x8x8xbf16>
    %23 = vector.shape_cast %22 : vector<1x8x8xbf16> to vector<8x8xbf16>
    %cst_26 = arith.constant dense<0.000000e+00> : vector<64x8xf32>
    %24 = tpu.matmul %21, %23, %cst_26 {dimension_numbers = #tpu.dot_dimension_numbers<[1], [0], [0], [1], [0, 0, 1, 1], [], []>} : vector<64x8xbf16>, vector<8x8xbf16>, vector<64x8xf32> -> vector<64x8xf32>
    %25 = arith.addf %18, %24 : vector<64x8xf32>
    %c0_27 = arith.constant 0 : index
    %c1_28 = arith.constant 1 : index
    %c0_29 = arith.constant 0 : index
    %c0_30 = arith.constant 0 : index
    %26 = vector.load %arg1[%c0_27, %c1_28, %c0_29, %c0_30] : memref<1x10x10x8xbf16, #tpu.memory_space<vmem>>, vector<1x8x8x8xbf16>
    %27 = vector.shape_cast %26 : vector<1x8x8x8xbf16> to vector<8x8x8xbf16>
    %28 = vector.shape_cast %27 : vector<8x8x8xbf16> to vector<64x8xbf16>
    %c3 = arith.constant 3 : index
    %c0_31 = arith.constant 0 : index
    %c0_32 = arith.constant 0 : index
    %29 = vector.load %arg2[%c3, %c0_31, %c0_32] : memref<9x8x8xbf16, #tpu.memory_space<vmem>>, vector<1x8x8xbf16>
    %30 = vector.shape_cast %29 : vector<1x8x8xbf16> to vector<8x8xbf16>
    %cst_33 = arith.constant dense<0.000000e+00> : vector<64x8xf32>
    %31 = tpu.matmul %28, %30, %cst_33 {dimension_numbers = #tpu.dot_dimension_numbers<[1], [0], [0], [1], [0, 0, 1, 1], [], []>} : vector<64x8xbf16>, vector<8x8xbf16>, vector<64x8xf32> -> vector<64x8xf32>
    %32 = arith.addf %25, %31 : vector<64x8xf32>
    %c0_34 = arith.constant 0 : index
    %c1_35 = arith.constant 1 : index
    %c1_36 = arith.constant 1 : index
    %c0_37 = arith.constant 0 : index
    %33 = vector.load %arg1[%c0_34, %c1_35, %c1_36, %c0_37] : memref<1x10x10x8xbf16, #tpu.memory_space<vmem>>, vector<1x8x8x8xbf16>
    %34 = vector.shape_cast %33 : vector<1x8x8x8xbf16> to vector<8x8x8xbf16>
    %35 = vector.shape_cast %34 : vector<8x8x8xbf16> to vector<64x8xbf16>
    %c4 = arith.constant 4 : index
    %c0_38 = arith.constant 0 : index
    %c0_39 = arith.constant 0 : index
    %36 = vector.load %arg2[%c4, %c0_38, %c0_39] : memref<9x8x8xbf16, #tpu.memory_space<vmem>>, vector<1x8x8xbf16>
    %37 = vector.shape_cast %36 : vector<1x8x8xbf16> to vector<8x8xbf16>
    %cst_40 = arith.constant dense<0.000000e+00> : vector<64x8xf32>
    %38 = tpu.matmul %35, %37, %cst_40 {dimension_numbers = #tpu.dot_dimension_numbers<[1], [0], [0], [1], [0, 0, 1, 1], [], []>} : vector<64x8xbf16>, vector<8x8xbf16>, vector<64x8xf32> -> vector<64x8xf32>
    %39 = arith.addf %32, %38 : vector<64x8xf32>
    %c0_41 = arith.constant 0 : index
    %c1_42 = arith.constant 1 : index
    %c2_43 = arith.constant 2 : index
    %c0_44 = arith.constant 0 : index
    %40 = vector.load %arg1[%c0_41, %c1_42, %c2_43, %c0_44] : memref<1x10x10x8xbf16, #tpu.memory_space<vmem>>, vector<1x8x8x8xbf16>
    %41 = vector.shape_cast %40 : vector<1x8x8x8xbf16> to vector<8x8x8xbf16>
    %42 = vector.shape_cast %41 : vector<8x8x8xbf16> to vector<64x8xbf16>
    %c5 = arith.constant 5 : index
    %c0_45 = arith.constant 0 : index
    %c0_46 = arith.constant 0 : index
    %43 = vector.load %arg2[%c5, %c0_45, %c0_46] : memref<9x8x8xbf16, #tpu.memory_space<vmem>>, vector<1x8x8xbf16>
    %44 = vector.shape_cast %43 : vector<1x8x8xbf16> to vector<8x8xbf16>
    %cst_47 = arith.constant dense<0.000000e+00> : vector<64x8xf32>
    %45 = tpu.matmul %42, %44, %cst_47 {dimension_numbers = #tpu.dot_dimension_numbers<[1], [0], [0], [1], [0, 0, 1, 1], [], []>} : vector<64x8xbf16>, vector<8x8xbf16>, vector<64x8xf32> -> vector<64x8xf32>
    %46 = arith.addf %39, %45 : vector<64x8xf32>
    %c0_48 = arith.constant 0 : index
    %c2_49 = arith.constant 2 : index
    %c0_50 = arith.constant 0 : index
    %c0_51 = arith.constant 0 : index
    %47 = vector.load %arg1[%c0_48, %c2_49, %c0_50, %c0_51] : memref<1x10x10x8xbf16, #tpu.memory_space<vmem>>, vector<1x8x8x8xbf16>
    %48 = vector.shape_cast %47 : vector<1x8x8x8xbf16> to vector<8x8x8xbf16>
    %49 = vector.shape_cast %48 : vector<8x8x8xbf16> to vector<64x8xbf16>
    %c6 = arith.constant 6 : index
    %c0_52 = arith.constant 0 : index
    %c0_53 = arith.constant 0 : index
    %50 = vector.load %arg2[%c6, %c0_52, %c0_53] : memref<9x8x8xbf16, #tpu.memory_space<vmem>>, vector<1x8x8xbf16>
    %51 = vector.shape_cast %50 : vector<1x8x8xbf16> to vector<8x8xbf16>
    %cst_54 = arith.constant dense<0.000000e+00> : vector<64x8xf32>
    %52 = tpu.matmul %49, %51, %cst_54 {dimension_numbers = #tpu.dot_dimension_numbers<[1], [0], [0], [1], [0, 0, 1, 1], [], []>} : vector<64x8xbf16>, vector<8x8xbf16>, vector<64x8xf32> -> vector<64x8xf32>
    %53 = arith.addf %46, %52 : vector<64x8xf32>
    %c0_55 = arith.constant 0 : index
    %c2_56 = arith.constant 2 : index
    %c1_57 = arith.constant 1 : index
    %c0_58 = arith.constant 0 : index
    %54 = vector.load %arg1[%c0_55, %c2_56, %c1_57, %c0_58] : memref<1x10x10x8xbf16, #tpu.memory_space<vmem>>, vector<1x8x8x8xbf16>
    %55 = vector.shape_cast %54 : vector<1x8x8x8xbf16> to vector<8x8x8xbf16>
    %56 = vector.shape_cast %55 : vector<8x8x8xbf16> to vector<64x8xbf16>
    %c7 = arith.constant 7 : index
    %c0_59 = arith.constant 0 : index
    %c0_60 = arith.constant 0 : index
    %57 = vector.load %arg2[%c7, %c0_59, %c0_60] : memref<9x8x8xbf16, #tpu.memory_space<vmem>>, vector<1x8x8xbf16>
    %58 = vector.shape_cast %57 : vector<1x8x8xbf16> to vector<8x8xbf16>
    %cst_61 = arith.constant dense<0.000000e+00> : vector<64x8xf32>
    %59 = tpu.matmul %56, %58, %cst_61 {dimension_numbers = #tpu.dot_dimension_numbers<[1], [0], [0], [1], [0, 0, 1, 1], [], []>} : vector<64x8xbf16>, vector<8x8xbf16>, vector<64x8xf32> -> vector<64x8xf32>
    %60 = arith.addf %53, %59 : vector<64x8xf32>
    %c0_62 = arith.constant 0 : index
    %c2_63 = arith.constant 2 : index
    %c2_64 = arith.constant 2 : index
    %c0_65 = arith.constant 0 : index
    %61 = vector.load %arg1[%c0_62, %c2_63, %c2_64, %c0_65] : memref<1x10x10x8xbf16, #tpu.memory_space<vmem>>, vector<1x8x8x8xbf16>
    %62 = vector.shape_cast %61 : vector<1x8x8x8xbf16> to vector<8x8x8xbf16>
    %63 = vector.shape_cast %62 : vector<8x8x8xbf16> to vector<64x8xbf16>
    %c8 = arith.constant 8 : index
    %c0_66 = arith.constant 0 : index
    %c0_67 = arith.constant 0 : index
    %64 = vector.load %arg2[%c8, %c0_66, %c0_67] : memref<9x8x8xbf16, #tpu.memory_space<vmem>>, vector<1x8x8xbf16>
    %65 = vector.shape_cast %64 : vector<1x8x8xbf16> to vector<8x8xbf16>
    %cst_68 = arith.constant dense<0.000000e+00> : vector<64x8xf32>
    %66 = tpu.matmul %63, %65, %cst_68 {dimension_numbers = #tpu.dot_dimension_numbers<[1], [0], [0], [1], [0, 0, 1, 1], [], []>} : vector<64x8xbf16>, vector<8x8xbf16>, vector<64x8xf32> -> vector<64x8xf32>
    %67 = arith.addf %60, %66 : vector<64x8xf32>
    %c0_69 = arith.constant 0 : index
    %c0_70 = arith.constant 0 : index
    %68 = vector.load %arg3[%c0_69, %c0_70] : memref<1x8xf32, #tpu.memory_space<vmem>>, vector<1x8xf32>
    %69 = vector.broadcast %68 : vector<1x8xf32> to vector<64x8xf32>
    %70 = arith.addf %67, %69 : vector<64x8xf32>
    %cst_71 = arith.constant 0.000000e+00 : f32
    %71 = vector.broadcast %cst_71 : f32 to vector<64x8xf32>
    %72 = arith.maximumf %70, %71 : vector<64x8xf32>
    %73 = vector.shape_cast %72 : vector<64x8xf32> to vector<8x8x8xf32>
    %c0_72 = arith.constant 0 : index
    %c0_73 = arith.constant 0 : index
    %c0_74 = arith.constant 0 : index
    %c0_75 = arith.constant 0 : index
    %74 = vector.load %arg6[%c0_72, %c0_73, %c0_74, %c0_75] : memref<1x8x8x8xf32, #tpu.memory_space<vmem>>, vector<1x8x8x8xf32>
    %75 = vector.shape_cast %74 : vector<1x8x8x8xf32> to vector<8x8x8xf32>
    %76 = vector.shape_cast %73 : vector<8x8x8xf32> to vector<1x8x8x8xf32>
    tpu.vector_store %arg6[%c0_72, %c0_73, %c0_74, %c0_75], %76 {strides = array<i32>} : memref<1x8x8x8xf32, #tpu.memory_space<vmem>>, vector<1x8x8x8xf32>,
    return
  }
  func.func @transform_0(%arg0: i32) -> (i32, i32, i32, i32) {
    %c0_i32 = arith.constant 0 : i32
    %c0_i32_0 = arith.constant 0 : i32
    %c0_i32_1 = arith.constant 0 : i32
    %c0_i32_2 = arith.constant 0 : i32
    return %arg0, %c0_i32, %c0_i32_0, %c0_i32_1 : i32, i32, i32, i32
  }
  func.func @transform_1(%arg0: i32) -> (i32, i32, i32) {
    %c0_i32 = arith.constant 0 : i32
    %c0_i32_0 = arith.constant 0 : i32
    %c0_i32_1 = arith.constant 0 : i32
    %c0_i32_2 = arith.constant 0 : i32
    return %c0_i32, %c0_i32_0, %c0_i32_1 : i32, i32, i32
  }
  func.func @transform_2(%arg0: i32) -> (i32, i32) {
    %c0_i32 = arith.constant 0 : i32
    %c0_i32_0 = arith.constant 0 : i32
    %c0_i32_1 = arith.constant 0 : i32
    return %c0_i32, %c0_i32_0 : i32, i32
  }
  func.func @transform_3(%arg0: i32) -> (i32, i32, i32, i32) {
    %c0_i32 = arith.constant 0 : i32
    %c0_i32_0 = arith.constant 0 : i32
    %c0_i32_1 = arith.constant 0 : i32
    %c0_i32_2 = arith.constant 0 : i32
    return %arg0, %c0_i32, %c0_i32_0, %c0_i32_1 : i32, i32, i32, i32
  }
  func.func @transform_4(%arg0: i32) -> (i32, i32) {
    %c0_i32 = arith.constant 0 : i32
    %c0_i32_0 = arith.constant 0 : i32
    %c0_i32_1 = arith.constant 0 : i32
    return %c0_i32, %c0_i32_0 : i32, i32
  }
  func.func @transform_5(%arg0: i32) -> (i32, i32, i32, i32) {
    %c0_i32 = arith.constant 0 : i32
    %c0_i32_0 = arith.constant 0 : i32
    %c0_i32_1 = arith.constant 0 : i32
    %c0_i32_2 = arith.constant 0 : i32
    return %arg0, %c0_i32, %c0_i32_0, %c0_i32_1 : i32, i32, i32, i32
  }
}

</mosaic_0001>

<bundles_post_ra>
// kernel: residual_block_forward.2
= control target key start
LH: loop header
LB: loop body
LE: loop exit
PB: predicated region body
PF: predicated region fallthrough
CT: control target
= control target key end

     0   :  { %s2100_s12 = smov 0   ;;  %s2380_s0 = inlined_call_operand.vmem [shape: bf16[8,9,9,4], index: 0, kind: input, shape index: {}]   ;;  %s2381_s1 = inlined_call_operand.vmem [shape: bf16[9,4,8], index: 1, kind: input, shape index: {}]   ;;  %s2382_s2 = inlined_call_operand.vmem [shape: f32[1,8], index: 2, kind: input, shape index: {}]   ;;  %s2383_s3 = inlined_call_operand.vmem [shape: bf16[2,8,8,8], index: 3, kind: output, shape index: {}]  }
   0x1 LB: > { %s2106_s13 = sadd.s32 4294967295, %s2078_s12   ;;  %p1667_p0 = scmp.ge.s32.totalorder %s2078_s12, 1  ;;  %s2078_s12 = sphi %s2100_s12, %s13_s12  }
   0x2   : > { %p139_p1 = scmp.lt.s32.totalorder %s2078_s12, 3 }
   0x4   : > { %p140_p2 = pnand %p1667_p0, %p139_p1 }
   0x5   : > { %v1680_v0 = vld [vmem:[%s2381_s1 + $0x2] sm:$0x3] (!%p140_p2)  ;;  %vm230_vm0 = vcmask (!%p140_p2), 1041408   ;;  %v2116_v1 = vld [vmem:[%s2381_s1 + $0x8] sm:$0x3] (!%p140_p2)  ;;  %s1668_s18 = sshll.u32 (!%p140_p2), %s2106_s13, 2 }
   0x6   : > { %143 = sbr.rel (%p140_p2) target bundleno = 318 (0x13e), region = 32  ;;  %2029 = vmatprep.subr.msk.bf16.mxu1 (!%p140_p2), %vm230_vm0, %v1680_v0  ;;  %2033 = vmatprep.subr.msk.bf16.mxu0 (!%p140_p2), %vm230_vm0, %v2116_v1  ;;  %v232_v2 = vsel (!%p140_p2), %vm230_vm0, %v1680_v0, 0  ;;  %v2125_v3 = vsel (!%p140_p2), %vm230_vm0, %v2116_v1, 0  ;;  %p165_p3 = scmp.lt.s32.totalorder (!%p140_p2), %s1668_s18, 7  ;;  %v185_v4 = vld [vmem:[%s2381_s1] sm:$0x3] (!%p140_p2) }
   0x7   : > { %1874 = vmatpush3.bf16.msra.mxu1 (!%p140_p2), %v232_v2  ;;  %1914 = vmatpush3.bf16.msra.mxu0 (!%p140_p2), %v2125_v3  ;;  %v1756_v5 = vld [vmem:[%s2381_s1 + $0xa] sm:$0x3] (!%p140_p2)  ;;  %vm217_vm1 = vcmask (!%p140_p2), 31744   ;;  %v332_v6 = vsel (!%p140_p2), %vm230_vm0, %v185_v4, 0  ;;  %v1773_v9 = vld [vmem:[%s2381_s1 + $0xc] sm:$0x3] (!%p140_p2) }
   0x8   : > { %2030 = vmatprep.subr.msk.bf16.mxu1 (!%p140_p2), %vm230_vm0, %v185_v4  ;;  %2035 = vmatprep.subr.msk.bf16.mxu0 (!%p140_p2), %vm230_vm0, %v1756_v5  ;;  %v1025_v7 = vsel (!%p140_p2), %vm230_vm0, %v1756_v5, 0  ;;  %v1697_v10 = vld [vmem:[%s2381_s1 + $0x4] sm:$0x3] (!%p140_p2)  ;;  %vm415_vm2 = vsmask.f32 (!%p140_p2), 3328  ;;  %v2159_v15 = vsel (!%p140_p2), %vm230_vm0, %v1773_v9, 0 }
   0x9   : > { %vm416_vm3 = vsmask.f32 (!%p140_p2), 7440  ;;  %v2162_v16 = vsel (!%p140_p2), %vm230_vm0, %v1697_v10, 0  ;;  %p171_p4 = scmp.lt.s32.totalorder (!%p140_p2), %s2106_s13, 1  ;;  %vm1599_vm5 = vcmask (!%p140_p2), 60416  }
   0xa   : > { %vm2179_vm4 = vmor (!%p140_p2), %vm415_vm2, %vm416_vm3 }
   0xd   : > { %s2387_s18 = smov (!%p165_p3, %s1668_s18), 7  ;;  %s2389_s13 = smov (!%p171_p4, %s2106_s13), 1 }
   0xe   : > { %s2039_s23 = smul.u32 72, %s2387_s18  ;;  %s1827_s14 = sshll.u32 %s2389_s13, 5 }
   0xf   : > { %s2359_s17 = scalar_lea.vmem %s2383_s3, %s1827_s14 }
  0x10   : > { %s2139_s26 = scalar_lea.vmem %s2380_s0, %s2039_s23 }
  0x11   : > { %v2048_v8 = vld [vmem:[%s2139_s26 + $0x48] ss:$8 sps:$4 sm:$0xff]   ;;  %v2049_v11 = vld [vmem:[%s2139_s26 + $0xd8] ss:$8 sps:$4 sm:$0xff]   ;;  %v1741_v19 = vld [vmem:[%s2139_s26 + $0x94] sm:$0x1] }
  0x12   : > { %1875 = vmatprep.mubr.msk.bf16.mxu1 %vm217_vm1, %v2048_v8  ;;  %v2050_v12 = vld [vmem:[%s2139_s26 + $0x58] ss:$8 sps:$4 sm:$0xff]   ;;  %1915 = vmatprep.mubr.msk.bf16.mxu0 %vm217_vm1, %v2049_v11  ;;  %v2051_v13 = vld [vmem:[%s2139_s26 + $0xe8] ss:$8 sps:$4 sm:$0xff]   ;;  %v1743_v21 = vld [vmem:[%s2139_s26 + $0x9c] sm:$0x1] }
  0x13   : > { %1876 = vmatmul.mubr.msk.bf16.vlgmr.msra.gmra.mrb[0].mxu1 %vm217_vm1, %v2050_v12  ;;  %v2052_v14 = vld [vmem:[%s2139_s26 + $0x68] ss:$8 sps:$4 sm:$0xff]   ;;  %1916 = vmatmul.mubr.msk.bf16.vlgmr.msra.gmra.mrb[0].mxu0 %vm217_vm1, %v2051_v13  ;;  %v2053_v17 = vld [vmem:[%s2139_s26 + $0x78] ss:$8 sps:$4 sm:$0xff]   ;;  %v896_v24 = vshll.u32 %v1741_v19, 16  ;;  %v910_v27 = vshll.u32 %v1743_v21, 16 }
  0x14   : > { %1884 = vmatpush3.bf16.msra.mxu1 %v332_v6  ;;  %1924 = vmatpush3.bf16.msra.mxu0 %v1025_v7  ;;  %v1740_v18 = vld [vmem:[%s2139_s26 + $0x90] sm:$0xf]  ;;  %v1742_v20 = vld [vmem:[%s2139_s26 + $0x98] sm:$0xf]  ;;  %v1744_v28 = vld [vmem:[%s2139_s26 + $0xa0] sm:$0xf] }
  0x15   : > { %1879 = vmatprep.mubr.msk.bf16.mxu1 %vm217_vm1, %v2052_v14  ;;  %v887_v22 = vshrl.u32 %v1740_v18, 16  ;;  %v890_v23 = vshll.u32 %v1740_v18, 16  ;;  %v901_v25 = vshrl.u32 %v1742_v20, 16  ;;  %2036 = vmatprep.subr.msk.bf16.mxu0 %vm230_vm0, %v1773_v9  ;;  %v904_v26 = vshll.u32 %v1742_v20, 16  ;;  %v1745_v29 = vld [vmem:[%s2139_s26 + $0xa4] sm:$0x1] }
  0x16   : > { %2031 = vmatprep.subr.msk.bf16.mxu1 %vm230_vm0, %v1697_v10  ;;  %v898_v32 = vrot.slane %v896_v24, 5  ;;  %v1746_v34 = vld [vmem:[%s2139_s26 + $0xa8] sm:$0xf]  ;;  %v912_v36 = vrot.slane %v910_v27, 5  ;;  %v1747_v37 = vld [vmem:[%s2139_s26 + $0xac] sm:$0x1] }
  0x17   : > { %v889_v30 = vrot.slane %v887_v22, 4  ;;  %v892_v31 = vrot.slane %v890_v23, 5  ;;  %v903_v33 = vrot.slane %v901_v25, 4  ;;  %v906_v35 = vrot.slane %v904_v26, 5  ;;  %v2054_v53 = vld [vmem:[%s2139_s26] ss:$8 sps:$4 sm:$0xff]  }
  0x18   : > { %v915_v38 = vshrl.u32 %v1744_v28, 16  ;;  %v918_v39 = vshll.u32 %v1744_v28, 16  ;;  %v924_v41 = vshll.u32 %v1745_v29, 16  ;;  %v929_v42 = vshrl.u32 %v1746_v34, 16  ;;  %v2055_v59 = vld [vmem:[%s2139_s26 + $0x10] ss:$8 sps:$4 sm:$0xff]  }
  0x19   : > { %v893_v40 = vor.u32 %v892_v31, %v889_v30  ;;  %v932_v43 = vshll.u32 %v1746_v34, 16  ;;  %v907_v45 = vor.u32 %v906_v35, %v903_v33  ;;  %v938_v48 = vshll.u32 %v1747_v37, 16  ;;  %v1748_v60 = vld [vmem:[%s2139_s26 + $0xb0] sm:$0xf]  ;;  %v1749_v61 = vld [vmem:[%s2139_s26 + $0xb4] sm:$0x1] }
  0x1a   : > { %v917_v46 = vrot.slane %v915_v38, 4  ;;  %v920_v47 = vrot.slane %v918_v39, 5  ;;  %v926_v50 = vrot.slane %v924_v41, 5  ;;  %v931_v51 = vrot.slane %v929_v42, 4  ;;  %v1750_v0 = vld [vmem:[%s2139_s26 + $0xb8] sm:$0xf] }
  0x1b   : > { %1880 = vmatmul.mubr.msk.bf16.gmra.mrb[4].mxu1 %vm217_vm1, %v2053_v17  ;;  %v894_v49 = vrot.slane %v893_v40, 4  ;;  %v934_v52 = vrot.slane %v932_v43, 5  ;;  %v908_v54 = vrot.slane %v907_v45, 4  ;;  %v940_v56 = vrot.slane %v938_v48, 5  ;;  %v1751_v2 = vld [vmem:[%s2139_s26 + $0xbc] sm:$0x1] }
  0x1c   : > { %v921_v55 = vor.u32 %v920_v47, %v917_v46  ;;  %1885 = vmatprep.mubr.msk.bf16.mxu1 %vm217_vm1, %v2054_v53  ;;  %v943_v4 = vshrl.u32 %v1748_v60, 16  ;;  %v946_v7 = vshll.u32 %v1748_v60, 16  ;;  %v952_v8 = vshll.u32 %v1749_v61, 16  ;;  %v1752_v9 = vld [vmem:[%s2139_s26 + $0xc0] sm:$0xf] }
  0x1d   : > { %v899_v57 = vsel %vm2179_vm4, %v894_v49, %v898_v32  ;;  %v935_v58 = vor.u32 %v934_v52, %v931_v51  ;;  %v913_v62 = vsel %vm2179_vm4, %v908_v54, %v912_v36  ;;  %v2198_v10 = vld [vmem:[%s2381_s1 + $0x6] sm:$0x3]  ;;  %v957_v13 = vshrl.u32 %v1750_v0, 16  ;;  %v1753_v17 = vld [vmem:[%s2139_s26 + $0xc4] sm:$0x1] }
  0x1e   : > { %v922_v63 = vrot.slane %v921_v55, 4  ;;  %v1757_v5 = vcombine.low %v899_v57, %v913_v62  ;;  %v945_v12 = vrot.slane %v943_v4, 4  ;;  %v960_v14 = vshll.u32 %v1750_v0, 16  ;;  %v1754_v22 = vld [vmem:[%s2139_s26 + $0xc8] sm:$0xf] }
  0x1f   : > { %v936_v6 = vrot.slane %v935_v58, 4  ;;  %v948_v19 = vrot.slane %v946_v7, 5  ;;  %v954_v20 = vrot.slane %v952_v8, 5  ;;  %v966_v21 = vshll.u32 %v1751_v2, 16  ;;  %v2210_v23 = vld [vmem:[%s2381_s1 + $0xe] sm:$0x3] }
  0x20   : > { %v927_v11 = vsel %vm2179_vm4, %v922_v63, %v926_v50  ;;  %1925 = vmatprep.mubr.msk.bf16.mxu0 %vm217_vm1, %v1757_v5  ;;  %v959_v25 = vrot.slane %v957_v13, 4  ;;  %v962_v26 = vrot.slane %v960_v14, 5  ;;  %v1755_v27 = vld [vmem:[%s2139_s26 + $0xcc] sm:$0x1]  ;;  %v971_v28 = vshrl.u32 %v1752_v9, 16 }
  0x21   : > { %v941_v18 = vsel %vm2179_vm4, %v936_v6, %v940_v56  ;;  %v949_v29 = vor.u32 %v948_v19, %v945_v12  ;;  %v968_v30 = vrot.slane %v966_v21, 5  ;;  %v974_v31 = vshll.u32 %v1752_v9, 16  ;;  %v2058_v53 = vld [vmem:[%s2139_s26 + $0x8] ss:$8 sps:$4 sm:$0xff]   ;;  %v399_v54 = vld [vmem:[%s2139_s26] sm:$0xf] }
  0x22   : > { %v1758_v24 = vcombine.low %v927_v11, %v941_v18  ;;  %v980_v32 = vshll.u32 %v1753_v17, 16  ;;  %v963_v33 = vor.u32 %v962_v26, %v959_v25  ;;  %v973_v34 = vrot.slane %v971_v28, 4  ;;  %v400_v56 = vld [vmem:[%s2139_s26 + $0x4] sm:$0x1]  ;;  %v401_v57 = vld [vmem:[%s2139_s26 + $0x8] sm:$0xf] }
  0x23   : > { %1886 = vmatmul.mubr.msk.bf16.vlgmr.msra.gmra.mrb[0].mxu1 %vm217_vm1, %v2055_v59  ;;  %v985_v35 = vshrl.u32 %v1754_v22, 16  ;;  %v988_v36 = vshll.u32 %v1754_v22, 16  ;;  %v950_v37 = vrot.slane %v949_v29, 4  ;;  %v976_v38 = vrot.slane %v974_v31, 5  ;;  %v402_v58 = vld [vmem:[%s2139_s26 + $0xc] sm:$0x1] }
  0x24   : > { %1894 = vmatpush3.bf16.msra.mxu1 %v2162_v16  ;;  %1926 = vmatmul.mubr.msk.bf16.vlgmr.msra.gmra.mrb[0].mxu0 %vm217_vm1, %v1758_v24  ;;  %v994_v39 = vshll.u32 %v1755_v27, 16  ;;  %v2056_v16 = vld [vmem:[%s2139_s26 + $0x20] ss:$8 sps:$4 sm:$0xff]   ;;  %v964_v40 = vrot.slane %v963_v33, 4  ;;  %v982_v46 = vrot.slane %v980_v32, 5  ;;  %v419_v60 = vshrl.u32 %v399_v54, 16 }
  0x25   : > { %2032 = vmatprep.subr.msk.bf16.mxu1 %vm230_vm0, %v2198_v10  ;;  %1934 = vmatpush3.bf16.msra.mxu0 %v2159_v15  ;;  %v987_v41 = vrot.slane %v985_v35, 4  ;;  %v990_v42 = vrot.slane %v988_v36, 5  ;;  %v955_v43 = vsel %vm2179_vm4, %v950_v37, %v954_v20  ;;  %v977_v45 = vor.u32 %v976_v38, %v973_v34  ;;  %v2057_v15 = vld [vmem:[%s2139_s26 + $0x30] ss:$8 sps:$4 sm:$0xff]   ;;  %v404_v6 = vld [vmem:[%s2139_s26 + $0x14] sm:$0x1] }
  0x26   : > { %2037 = vmatprep.subr.msk.bf16.mxu0 %vm230_vm0, %v2210_v23  ;;  %1889 = vmatprep.mubr.msk.bf16.mxu1 %vm217_vm1, %v2056_v16  ;;  %v969_v47 = vsel %vm2179_vm4, %v964_v40, %v968_v30  ;;  %v996_v49 = vrot.slane %v994_v39, 5  ;;  %v422_v61 = vshll.u32 %v399_v54, 16  ;;  %v428_v62 = vshll.u32 %v400_v56, 16  ;;  %v403_v63 = vld [vmem:[%s2139_s26 + $0x10] sm:$0xf] }
  0x27   : > { %v991_v48 = vor.u32 %v990_v42, %v987_v41  ;;  %v1759_v50 = vcombine.low %v955_v43, %v969_v47  ;;  %v978_v51 = vrot.slane %v977_v45, 4  ;;  %v433_v2 = vshrl.u32 %v401_v57, 16  ;;  %v405_v11 = vld [vmem:[%s2139_s26 + $0x18] sm:$0xf]  ;;  %v406_v18 = vld [vmem:[%s2139_s26 + $0x1c] sm:$0x1] }
  0x28   : > { %v436_v4 = vshll.u32 %v401_v57, 16  ;;  %v442_v5 = vshll.u32 %v402_v58, 16  ;;  %v421_v7 = vrot.slane %v419_v60, 4  ;;  %v424_v8 = vrot.slane %v422_v61, 5  ;;  %v2059_v29 = vld [vmem:[%s2139_s26 + $0x18] ss:$8 sps:$4 sm:$0xff]  }
  0x29   : > { %v992_v52 = vrot.slane %v991_v48, 4  ;;  %1929 = vmatprep.mubr.msk.bf16.mxu0 %vm217_vm1, %v1759_v50  ;;  %v983_v55 = vsel %vm2179_vm4, %v978_v51, %v982_v46  ;;  %v430_v9 = vrot.slane %v428_v62, 5  ;;  %v447_v12 = vshrl.u32 %v403_v63, 16  ;;  %v2060_v37 = vld [vmem:[%s2139_s26 + $0x28] ss:$8 sps:$4 sm:$0xff]  }
  0x2a   : > { %v435_v13 = vrot.slane %v433_v2, 4  ;;  %v438_v14 = vrot.slane %v436_v4, 5  ;;  %v444_v17 = vrot.slane %v442_v5, 5  ;;  %v450_v19 = vshll.u32 %v403_v63, 16  ;;  %v407_v40 = vld [vmem:[%s2139_s26 + $0x20] sm:$0xf] }
  0x2b   : > { %1890 = vmatmul.mubr.msk.bf16.gmra.mrb[4].mxu1 %vm217_vm1, %v2057_v15  ;;  %v997_v59 = vsel %vm2179_vm4, %v992_v52, %v996_v49  ;;  %v425_v20 = vor.u32 %v424_v8, %v421_v7  ;;  %v449_v21 = vrot.slane %v447_v12, 4  ;;  %v456_v22 = vshll.u32 %v404_v6, 16  ;;  %v408_v45 = vld [vmem:[%s2139_s26 + $0x24] sm:$0x1]  ;;  %v409_v46 = vld [vmem:[%s2139_s26 + $0x28] sm:$0xf] }
  0x2c   : > { %v1760_v0 = vcombine.low %v983_v55, %v997_v59  ;;  %v461_v24 = vshrl.u32 %v405_v11, 16  ;;  %v439_v25 = vor.u32 %v438_v14, %v435_v13  ;;  %v452_v26 = vrot.slane %v450_v19, 5  ;;  %v410_v48 = vld [vmem:[%s2139_s26 + $0x2c] sm:$0x1]  ;;  %v411_v55 = vld [vmem:[%s2139_s26 + $0x30] sm:$0xf] }
  0x2d   : > { %v464_v27 = vshll.u32 %v405_v11, 16  ;;  %v470_v28 = vshll.u32 %v406_v18, 16  ;;  %v1263_v30 = vsel %vm230_vm0, %v2210_v23, 0  ;;  %v426_v31 = vrot.slane %v425_v20, 4  ;;  %v2257_v23 = vld [vmem:[%s2381_s1 + $0x10] sm:$0x3] }
  0x2e   : > { %1930 = vmatmul.mubr.msk.bf16.gmra.mrb[4].mxu0 %vm217_vm1, %v1760_v0  ;;  %v458_v32 = vrot.slane %v456_v22, 5  ;;  %v463_v33 = vrot.slane %v461_v24, 4  ;;  %v440_v34 = vrot.slane %v439_v25, 4  ;;  %v453_v35 = vor.u32 %v452_v26, %v449_v21  ;;  %v412_v60 = vld [vmem:[%s2139_s26 + $0x34] sm:$0x1] }
  0x2f   : > { %1935 = vmatprep.mubr.msk.bf16.mxu0 %vm217_vm1, %v2058_v53  ;;  %v466_v36 = vrot.slane %v464_v27, 5  ;;  %v431_v38 = vsel %vm2179_vm4, %v426_v31, %v430_v9  ;;  %v472_v39 = vrot.slane %v470_v28, 5  ;;  %v676_v16 = vsel %vm230_vm0, %v2198_v10, 0  ;;  %v2061_v62 = vld [vmem:[%s2139_s26 + $0x38] ss:$8 sps:$4 sm:$0xff]  }
  0x30   : > { %v445_v41 = vsel %vm2179_vm4, %v440_v34, %v444_v17  ;;  %v454_v42 = vrot.slane %v453_v35, 4  ;;  %v475_v15 = vshrl.u32 %v407_v40, 16  ;;  %v478_v49 = vshll.u32 %v407_v40, 16  ;;  %v413_v0 = vld [vmem:[%s2139_s26 + $0x38] sm:$0xf] }
  0x31   : > { %v467_v43 = vor.u32 %v466_v36, %v463_v33  ;;  %v1698_v47 = vcombine.low %v431_v38, %v445_v41  ;;  %v484_v10 = vshll.u32 %v408_v45, 16  ;;  %v489_v50 = vshrl.u32 %v409_v46, 16  ;;  %v414_v2 = vld [vmem:[%s2139_s26 + $0x3c] sm:$0x1]  ;;  %v2062_v14 = vld [vmem:[%s2139_s26 + $0x50] ss:$8 sps:$4 sm:$0xff]  }
  0x32   : > { %v459_v51 = vsel %vm2179_vm4, %v454_v42, %v458_v32  ;;  %v477_v53 = vrot.slane %v475_v15, 4  ;;  %v492_v54 = vshll.u32 %v409_v46, 16  ;;  %v480_v56 = vrot.slane %v478_v49, 5  ;;  %v2063_v35 = vld [vmem:[%s2139_s26 + $0x60] ss:$8 sps:$4 sm:$0xff]  }
  0x33   : > { %v468_v52 = vrot.slane %v467_v43, 4  ;;  %1895 = vmatprep.mubr.msk.bf16.mxu1 %vm217_vm1, %v1698_v47  ;;  %v486_v57 = vrot.slane %v484_v10, 5  ;;  %v491_v58 = vrot.slane %v489_v50, 4  ;;  %v498_v59 = vshll.u32 %v410_v48, 16  ;;  %v1800_v40 = vld [vmem:[%s2139_s26 + $0xc] sm:$0x1] }
  0x34   : > { %v494_v63 = vrot.slane %v492_v54, 5  ;;  %v503_v4 = vshrl.u32 %v411_v55, 16  ;;  %v481_v6 = vor.u32 %v480_v56, %v477_v53  ;;  %v506_v8 = vshll.u32 %v411_v55, 16  ;;  %v1801_v41 = vld [vmem:[%s2139_s26 + $0x10] sm:$0xf] }
  0x35   : > { %v473_v61 = vsel %vm2179_vm4, %v468_v52, %v472_v39  ;;  %v500_v7 = vrot.slane %v498_v59, 5  ;;  %v512_v12 = vshll.u32 %v412_v60, 16  ;;  %v517_v13 = vshrl.u32 %v413_v0, 16  ;;  %v2066_v39 = vld [vmem:[%s2139_s26 + $0x70] ss:$8 sps:$4 sm:$0xff]  }
  0x36   : > { %1936 = vmatmul.mubr.msk.bf16.vlgmr.msra.gmra.mrb[0].mxu0 %vm217_vm1, %v2059_v29  ;;  %v1699_v5 = vcombine.low %v459_v51, %v473_v61  ;;  %v495_v9 = vor.u32 %v494_v63, %v491_v58  ;;  %v505_v11 = vrot.slane %v503_v4, 4  ;;  %v482_v17 = vrot.slane %v481_v6, 4  ;;  %v1802_v42 = vld [vmem:[%s2139_s26 + $0x14] sm:$0x1]  ;;  %v1803_v48 = vld [vmem:[%s2139_s26 + $0x18] sm:$0xf] }
  0x37   : > { %1944 = vmatpush3.bf16.msra.mxu0 %v1263_v30  ;;  %1939 = vmatprep.mubr.msk.bf16.mxu0 %vm217_vm1, %v2060_v37  ;;  %v508_v18 = vrot.slane %v506_v8, 5  ;;  %v520_v19 = vshll.u32 %v413_v0, 16  ;;  %v526_v20 = vshll.u32 %v414_v2, 16  ;;  %v519_v22 = vrot.slane %v517_v13, 4  ;;  %v2064_v37 = vld [vmem:[%s2139_s26 + $0x90] ss:$8 sps:$4 sm:$0xff]  }
  0x38   : > { %2038 = vmatprep.subr.msk.bf16.mxu0 %vm230_vm0, %v2257_v23  ;;  %1896 = vmatmul.mubr.msk.bf16.vlgmr.msra.gmra.mrb[0].mxu1 %vm217_vm1, %v1699_v5  ;;  %v496_v21 = vrot.slane %v495_v9, 4  ;;  %v487_v24 = vsel %vm2179_vm4, %v482_v17, %v486_v57  ;;  %v514_v26 = vrot.slane %v512_v12, 5  ;;  %v1493_v34 = vsel %vm230_vm0, %v2257_v23, 0  ;;  %v1804_v50 = vld [vmem:[%s2139_s26 + $0x1c] sm:$0x1] }
  0x39   : > { %1904 = vmatpush3.bf16.msra.mxu1 %v676_v16  ;;  %v509_v25 = vor.u32 %v508_v18, %v505_v11  ;;  %v522_v27 = vrot.slane %v520_v19, 5  ;;  %v528_v32 = vrot.slane %v526_v20, 5  ;;  %v1799_v16 = vld [vmem:[%s2139_s26 + $0x8] sm:$0xf]  ;;  %v1364_v23 = vshll.u32 %v1800_v40, 16 }
  0x3a   : > { %2034 = vmatprep.subr.msk.bf16.mxu1 %vm230_vm0, %v2116_v1  ;;  %v501_v28 = vsel %vm2179_vm4, %v496_v21, %v500_v7  ;;  %v1355_v43 = vshrl.u32 %v1799_v16, 16  ;;  %v1358_v45 = vshll.u32 %v1799_v16, 16  ;;  %v1369_v46 = vshrl.u32 %v1801_v41, 16  ;;  %v1805_v51 = vld [vmem:[%s2139_s26 + $0x20] sm:$0xf] }
  0x3b   : > { %v1700_v29 = vcombine.low %v487_v24, %v501_v28  ;;  %v510_v30 = vrot.slane %v509_v25, 4  ;;  %v523_v31 = vor.u32 %v522_v27, %v519_v22  ;;  %v1372_v15 = vshll.u32 %v1801_v41, 16  ;;  %v2065_v52 = vld [vmem:[%s2139_s26 + $0xa0] ss:$8 sps:$4 sm:$0xff]   ;;  %v1806_v58 = vld [vmem:[%s2139_s26 + $0x24] sm:$0x1] }
  0x3c   : > { %v1378_v47 = vshll.u32 %v1802_v42, 16  ;;  %v1357_v49 = vrot.slane %v1355_v43, 4  ;;  %v1360_v10 = vrot.slane %v1358_v45, 5  ;;  %v2067_v53 = vld [vmem:[%s2139_s26 + $0x80] ss:$8 sps:$4 sm:$0xff]   ;;  %v1366_v54 = vrot.slane %v1364_v23, 5 }
  0x3d   : > { %1899 = vmatprep.mubr.msk.bf16.mxu1 %vm217_vm1, %v1700_v29  ;;  %v515_v1 = vsel %vm2179_vm4, %v510_v30, %v514_v26  ;;  %v524_v33 = vrot.slane %v523_v31, 4  ;;  %v1371_v55 = vrot.slane %v1369_v46, 4  ;;  %v1374_v56 = vrot.slane %v1372_v15, 5  ;;  %v2068_v5 = vld [vmem:[%s2139_s26 + $0xb0] ss:$8 sps:$4 sm:$0xff]  }
  0x3e   : > { %1940 = vmatmul.mubr.msk.bf16.gmra.mrb[4].mxu0 %vm217_vm1, %v2061_v62  ;;  %v1380_v57 = vrot.slane %v1378_v47, 5  ;;  %v1361_v59 = vor.u32 %v1360_v10, %v1357_v49  ;;  %v1383_v60 = vshrl.u32 %v1803_v48, 16  ;;  %v1386_v61 = vshll.u32 %v1803_v48, 16  ;;  %v1807_v17 = vld [vmem:[%s2139_s26 + $0x28] sm:$0xf] }
  0x3f   : > { %1945 = vmatprep.mubr.msk.bf16.mxu0 %vm217_vm1, %v2062_v14  ;;  %v529_v36 = vsel %vm2179_vm4, %v524_v33, %v528_v32  ;;  %v1392_v62 = vshll.u32 %v1804_v50, 16  ;;  %v1375_v63 = vor.u32 %v1374_v56, %v1371_v55  ;;  %v1397_v0 = vshrl.u32 %v1805_v51, 16  ;;  %v1808_v20 = vld [vmem:[%s2139_s26 + $0x2c] sm:$0x1]  ;;  %v1809_v21 = vld [vmem:[%s2139_s26 + $0x30] sm:$0xf] }
  0x40   : > { %v1701_v38 = vcombine.low %v515_v1, %v529_v36  ;;  %v1400_v2 = vshll.u32 %v1805_v51, 16  ;;  %v1406_v4 = vshll.u32 %v1806_v58, 16  ;;  %v1362_v6 = vrot.slane %v1361_v59, 4  ;;  %v1810_v22 = vld [vmem:[%s2139_s26 + $0x34] sm:$0x1] }
  0x41   : > { %v1385_v7 = vrot.slane %v1383_v60, 4  ;;  %v1388_v8 = vrot.slane %v1386_v61, 5  ;;  %v1394_v9 = vrot.slane %v1392_v62, 5  ;;  %v1376_v11 = vrot.slane %v1375_v63, 4  ;;  %v2069_v32 = vld [vmem:[%s2139_s26 + $0xc0] ss:$8 sps:$4 sm:$0xff]  }
  0x42   : > { %1900 = vmatmul.mubr.msk.bf16.gmra.mrb[4].mxu1 %vm217_vm1, %v1701_v38  ;;  %v1399_v12 = vrot.slane %v1397_v0, 4  ;;  %v1402_v13 = vrot.slane %v1400_v2, 5  ;;  %v1408_v14 = vrot.slane %v1406_v4, 5  ;;  %v1367_v18 = vsel %vm2179_vm4, %v1362_v6, %v1366_v54  ;;  %v1811_v36 = vld [vmem:[%s2139_s26 + $0x38] sm:$0xf] }
  0x43   : > { %1905 = vmatprep.mubr.msk.bf16.mxu1 %vm217_vm1, %v2064_v37  ;;  %v1389_v19 = vor.u32 %v1388_v8, %v1385_v7  ;;  %v1381_v24 = vsel %vm2179_vm4, %v1376_v11, %v1380_v57  ;;  %v1411_v26 = vshrl.u32 %v1807_v17, 16  ;;  %v1414_v27 = vshll.u32 %v1807_v17, 16  ;;  %v1812_v16 = vld [vmem:[%s2139_s26 + $0x3c] sm:$0x1]  ;;  %v1813_v43 = vld [vmem:[%s2139_s26 + $0x40] sm:$0xf] }
  0x44   : > { %v1403_v25 = vor.u32 %v1402_v13, %v1399_v12  ;;  %v1816_v28 = vcombine.low %v1367_v18, %v1381_v24  ;;  %v1420_v30 = vshll.u32 %v1808_v20, 16  ;;  %v1425_v31 = vshrl.u32 %v1809_v21, 16  ;;  %v1814_v45 = vld [vmem:[%s2139_s26 + $0x44] sm:$0x1]  ;;  %v2070_v15 = vld [vmem:[%s2139_s26 + $0xf8] ss:$8 sps:$4 sm:$0xff]  }
  0x45   : > { %v1390_v29 = vrot.slane %v1389_v19, 4  ;;  %v1413_v33 = vrot.slane %v1411_v26, 4  ;;  %v1439_v23 = vshrl.u32 %v1811_v36, 16  ;;  %v1442_v48 = vshll.u32 %v1811_v36, 16  ;;  %v2071_v8 = vld [vmem:[%s2139_s26 + $0x108] ss:$8 sps:$4 sm:$0xff]  }
  0x46   : > { %1946 = vmatmul.mubr.msk.bf16.vlgmr.msra.gmra.mrb[0].mxu0 %vm217_vm1, %v2063_v35  ;;  %v1404_v1 = vrot.slane %v1403_v25, 4  ;;  %v1428_v35 = vshll.u32 %v1809_v21, 16  ;;  %v1422_v37 = vrot.slane %v1420_v30, 5  ;;  %v1427_v38 = vrot.slane %v1425_v31, 4  ;;  %v1824_v18 = vld [vmem:[%s2382_s2] ss:$0 sm:$0xff] }
  0x47   : > { %1954 = vmatpush3.bf16.msra.mxu0 %v1493_v34  ;;  %1949 = vmatprep.mubr.msk.bf16.mxu0 %vm217_vm1, %v2066_v39  ;;  %v1416_v34 = vrot.slane %v1414_v27, 5  ;;  %v1434_v39 = vshll.u32 %v1810_v22, 16  ;;  %v1448_v49 = vshll.u32 %v1812_v16, 16  ;;  %v1441_v51 = vrot.slane %v1439_v23, 4 }
  0x48   : > { %v1409_v40 = vsel %vm2179_vm4, %v1404_v1, %v1408_v14  ;;  %v1430_v42 = vrot.slane %v1428_v35, 5  ;;  %v1456_v54 = vshll.u32 %v1813_v43, 16  ;;  %v1462_v55 = vshll.u32 %v1814_v45, 16 }
  0x49   : > { %v1417_v41 = vor.u32 %v1416_v34, %v1413_v33  ;;  %v1436_v47 = vrot.slane %v1434_v39, 5  ;;  %v1450_v60 = vrot.slane %v1448_v49, 5 }
  0x4a   : > { %1906 = vmatmul.mubr.msk.bf16.vlgmr.msra.gmra.mrb[0].mxu1 %vm217_vm1, %v2065_v52  ;;  %v1431_v50 = vor.u32 %v1430_v42, %v1427_v38  ;;  %v1453_v52 = vshrl.u32 %v1813_v43, 16  ;;  %v1458_v61 = vrot.slane %v1456_v54, 5  ;;  %v1464_v4 = vrot.slane %v1462_v55, 5 }
  0x4b   : > { %1964 = vmatpush3.bf16.msra.mxu1 %v2125_v3  ;;  %1909 = vmatprep.mubr.msk.bf16.mxu1 %vm217_vm1, %v2068_v5  ;;  %v1395_v3 = vsel %vm2179_vm4, %v1390_v29, %v1394_v9  ;;  %v1418_v10 = vrot.slane %v1417_v41, 4 }
  0x4c   : > { %v1817_v46 = vcombine.low %v1395_v3, %v1409_v40  ;;  %v1432_v57 = vrot.slane %v1431_v50, 4  ;;  %v1455_v58 = vrot.slane %v1453_v52, 4 }
  0x4d   : > { %v1423_v56 = vsel %vm2179_vm4, %v1418_v10, %v1422_v37 }
  0x4e   : > { %1950 = vmatmul.mubr.msk.bf16.gmra.mrb[4].mxu0 %vm217_vm1, %v2067_v53  ;;  %v1444_v53 = vrot.slane %v1442_v48, 5  ;;  %v1437_v62 = vsel %vm2179_vm4, %v1432_v57, %v1436_v47  ;;  %v1459_v2 = vor.u32 %v1458_v61, %v1455_v58 }
  0x4f   : > { %1955 = vmatprep.mubr.msk.bf16.mxu0 %vm217_vm1, %v1816_v28  ;;  %v1818_v63 = vcombine.low %v1423_v56, %v1437_v62 }
  0x50   : > { %v1445_v59 = vor.u32 %v1444_v53, %v1441_v51  ;;  %v1460_v6 = vrot.slane %v1459_v2, 4 }
  0x52   : > { %1910 = vmatmul.mubr.msk.bf16.gmra.mrb[4].mxu1 %vm217_vm1, %v2069_v32  ;;  %v1446_v0 = vrot.slane %v1445_v59, 4  ;;  %v1465_v7 = vsel %vm2179_vm4, %v1460_v6, %v1464_v4 }
  0x53   : > { %1919 = vmatprep.mubr.msk.bf16.mxu1 %vm217_vm1, %v2070_v15 }
  0x54   : > { %v1451_v5 = vsel %vm2179_vm4, %v1446_v0, %v1450_v60 }
  0x55   : > { %v1819_v9 = vcombine.low %v1451_v5, %v1465_v7 }
  0x56   : > { %1956 = vmatmul.mubr.msk.bf16.vlgmr.msra.gmra.mrb[0].mxu0 %vm217_vm1, %v1817_v46 }
  0x57   : > { %1959 = vmatprep.mubr.msk.bf16.mxu0 %vm217_vm1, %v1818_v63 }
  0x5e   : > { %1960 = vmatmul.mubr.msk.bf16.gmra.mrb[4].mxu0 %vm217_vm1, %v1819_v9  ;;  %1920 = vmatmul.mubr.msk.bf16.vlgmr.msra.gmra.mrb[4].mxu1 %vm217_vm1, %v2071_v8 }
 0x11d   : > { %v1907_v11 = vpop.f32.mrb[0].mxu1 }
 0x11e   : > { %v712_v12 = vpop.f32.mrb[1].mxu1 }
 0x11f   : > { %v1908_v13 = vpop.f32.mrb[2].mxu1 }
 0x120   : > { %v715_v14 = vpop.f32.mrb[3].mxu1 }
 0x129   : > { %v1957_v17 = vpop.f32.mrb[0].mxu0 }
 0x12a   : > { %v1965_v19 = vadd.f32 %v1957_v17, %v1907_v11  ;;  %v1529_v44 = vpop.f32.mrb[1].mxu0 }
 0x12b   : > { %v1966_v20 = vadd.f32 %v1529_v44, %v712_v12  ;;  %v1958_v21 = vpop.f32.mrb[2].mxu0 }
 0x12c   : > { %v1577_v22 = vadd.f32 %v1965_v19, %v1824_v18  ;;  %v1967_v24 = vadd.f32 %v1958_v21, %v1908_v13  ;;  %v1532_v25 = vpop.f32.mrb[3].mxu0 }
 0x12d   : > { %v1575_v26 = vadd.f32 %v1966_v20, %v1824_v18  ;;  %v1968_v27 = vadd.f32 %v1532_v25, %v715_v14 }
 0x12e   : > { %v1585_v28 = vmax.f32 %v1577_v22, 0.0  ;;  %v1578_v29 = vadd.f32 %v1967_v24, %v1824_v18 }
 0x12f   : > { %v1583_v30 = vmax.f32 %v1575_v26, 0.0  ;;  %v1576_v31 = vadd.f32 %v1968_v27, %v1824_v18 }
 0x130   : > { %v1593_v32 = vpack.c.bf16 %v1585_v28, %v1585_v28  ;;  %v1586_v1 = vmax.f32 %v1578_v29, 0.0 }
 0x131   : > { %v1591_v33 = vpack.c.bf16 %v1583_v30, %v1583_v30  ;;  %v1584_v34 = vmax.f32 %v1576_v31, 0.0  ;;  %v1961_v3 = vpop.f32.mrb[4].mxu0  ;;  %v1921_v38 = vpop.f32.mrb[4].mxu1 }
 0x132   : > { %1602 = vst.msk [vmem:[%s2359_s17 + $0x8] sm:$0xf] %vm1599_vm5, %v1593_v32  ;;  %v1594_v35 = vpack.c.bf16 %v1586_v1, %v1586_v1  ;;  %v1545_v37 = vpop.f32.mrb[5].mxu0  ;;  %v1969_v16 = vadd.f32 %v1961_v3, %v1921_v38  ;;  %v847_v40 = vpop.f32.mrb[5].mxu1 }
 0x133   : > { %1600 = vst.msk [vmem:[%s2359_s17] sm:$0xf] %vm1599_vm5, %v1591_v33  ;;  %v1592_v36 = vpack.c.bf16 %v1584_v34, %v1584_v34  ;;  %v1962_v39 = vpop.f32.mrb[6].mxu0  ;;  %v1970_v42 = vadd.f32 %v1545_v37, %v847_v40  ;;  %v1922_v43 = vpop.f32.mrb[6].mxu1 }
 0x134   : > { %1603 = vst.msk [vmem:[%s2359_s17 + $0xc] sm:$0xf] %vm1599_vm5, %v1594_v35  ;;  %v1548_v41 = vpop.f32.mrb[7].mxu0  ;;  %v1581_v45 = vadd.f32 %v1969_v16, %v1824_v18  ;;  %v1971_v23 = vadd.f32 %v1962_v39, %v1922_v43  ;;  %v850_v46 = vpop.f32.mrb[7].mxu1 }
 0x135   : > { %1601 = vst.msk [vmem:[%s2359_s17 + $0x4] sm:$0xf] %vm1599_vm5, %v1592_v36  ;;  %v1579_v15 = vadd.f32 %v1970_v42, %v1824_v18  ;;  %v1972_v47 = vadd.f32 %v1548_v41, %v850_v46 }
 0x136   : > { %v1589_v48 = vmax.f32 %v1581_v45, 0.0  ;;  %v1582_v49 = vadd.f32 %v1971_v23, %v1824_v18 }
 0x137   : > { %v1587_v10 = vmax.f32 %v1579_v15, 0.0  ;;  %v1580_v50 = vadd.f32 %v1972_v47, %v1824_v18 }
 0x138   : > { %v1597_v51 = vpack.c.bf16 %v1589_v48, %v1589_v48  ;;  %v1590_v52 = vmax.f32 %v1582_v49, 0.0 }
 0x139   : > { %v1595_v53 = vpack.c.bf16 %v1587_v10, %v1587_v10  ;;  %v1588_v54 = vmax.f32 %v1580_v50, 0.0 }
 0x13a   : > { %1606 = vst.msk [vmem:[%s2359_s17 + $0x18] sm:$0xf] %vm1599_vm5, %v1597_v51  ;;  %v1598_v55 = vpack.c.bf16 %v1590_v52, %v1590_v52 }
 0x13b   : > { %1604 = vst.msk [vmem:[%s2359_s17 + $0x10] sm:$0xf] %vm1599_vm5, %v1595_v53  ;;  %v1596_v56 = vpack.c.bf16 %v1588_v54, %v1588_v54 }
 0x13c   : > { %1607 = vst.msk [vmem:[%s2359_s17 + $0x1c] sm:$0xf] %vm1599_vm5, %v1598_v55 }
 0x13d   : > { %1605 = vst.msk [vmem:[%s2359_s17 + $0x14] sm:$0xf] %vm1599_vm5, %v1596_v56 }
 0x13e PF: > { %s13_s12 = sadd.s32 1, %s2078_s12  }
 0x13f   : > { %p10_p5 = scmp.ge.s32.totalorder %s13_s12, 4  }
 0x141   :  { %12 = sbr.rel (!%p10_p5) target bundleno = 1 (0x1), region = 75 }

// kernel: residual_block_forward.3
= control target key start
LH: loop header
LB: loop body
LE: loop exit
PB: predicated region body
PF: predicated region fallthrough
CT: control target
= control target key end

     0   :  { %s2460_s18 = smov 0   ;;  %s2938_s0 = inlined_call_operand.vmem [shape: bf16[2,10,10,8], index: 0, kind: input, shape index: {}]   ;;  %s2939_s1 = inlined_call_operand.vmem [shape: bf16[9,8,8], index: 1, kind: input, shape index: {}]   ;;  %s2940_s2 = inlined_call_operand.vmem [shape: f32[1,8], index: 2, kind: input, shape index: {}]   ;;  %s2941_s3 = inlined_call_operand.vmem [shape: bf16[2,8,8,4], index: 3, kind: input, shape index: {}]   ;;  %s2942_s4 = inlined_call_operand.vmem [shape: bf16[4,8], index: 4, kind: input, shape index: {}]   ;;  %s2943_s5 = inlined_call_operand.vmem [shape: f32[2,8,8,8], index: 5, kind: output, shape index: {}]  }
   0x1 LB: > { %s1974_s19 = sadd.s32 4294967295, %s2428_s18   ;;  %p1978_p0 = scmp.ge.s32.totalorder %s2428_s18, 1  ;;  %s2428_s18 = sphi %s2460_s18, %s15_s18  }
   0x2   : > { %p197_p1 = scmp.lt.s32.totalorder %s2428_s18, 3 }
   0x4   : > { %p198_p2 = pnand %p1978_p0, %p197_p1 }
   0x5   : > { %v263_v0 = vld [vmem:[%s2939_s1] sm:$0xf] (!%p198_p2)  ;;  %vm297_vm0 = vcmask (!%p198_p2), 1043456   ;;  %p230_p3 = scmp.lt.s32.totalorder (!%p198_p2), %s1974_s19, 1  ;;  %vm399_vm1 = vcmask (!%p198_p2), 1041408   ;;  %vm284_vm2 = vcmask (!%p198_p2), 64512  }
   0x6   : > { %201 = sbr.rel (%p198_p2) target bundleno = 336 (0x150), region = 40  ;;  %2387 = vmatprep.subr.msk.bf16.mxu1 (!%p198_p2), %vm297_vm0, %v263_v0  ;;  %v299_v1 = vsel (!%p198_p2), %vm297_vm0, %v263_v0, 0  ;;  %v2059_v2 = vld [vmem:[%s2939_s1 + $0x10] sm:$0xf] (!%p198_p2)  ;;  %v254_v3 = vld [vmem:[%s2942_s4] sm:$0x3] (!%p198_p2) }
   0x7   : > { %2216 = vmatpush3.bf16.msra.mxu1 (!%p198_p2), %v299_v1  ;;  %2392 = vmatprep.subr.msk.bf16.mxu0 (!%p198_p2), %vm297_vm0, %v2059_v2  ;;  %v1136_v4 = vsel (!%p198_p2), %vm297_vm0, %v2059_v2, 0  ;;  %v2084_v5 = vld [vmem:[%s2939_s1 + $0x14] sm:$0xf] (!%p198_p2)  ;;  %v2000_v6 = vld [vmem:[%s2939_s1 + $0x4] sm:$0xf] (!%p198_p2)  ;;  %v401_v7 = vsel (!%p198_p2), %vm399_vm1, %v254_v3, 0 }
   0x8   : > { %2266 = vmatpush3.bf16.msra.mxu0 (!%p198_p2), %v1136_v4  ;;  %2388 = vmatprep.subr.msk.bf16.mxu1 (!%p198_p2), %vm399_vm1, %v254_v3  ;;  %v2495_v8 = vsel (!%p198_p2), %vm297_vm0, %v2084_v5, 0  ;;  %v2505_v9 = vld [vmem:[%s2939_s1 + $0x18] sm:$0xf] (!%p198_p2)  ;;  %v2508_v10 = vsel (!%p198_p2), %vm297_vm0, %v2000_v6, 0  ;;  %vm484_vm3 = vsmask.f32 (!%p198_p2), 3328 }
   0x9   : > { %2393 = vmatprep.subr.msk.bf16.mxu0 (!%p198_p2), %vm297_vm0, %v2084_v5  ;;  %vm485_vm4 = vsmask.f32 (!%p198_p2), 7440  ;;  %v2518_v11 = vld [vmem:[%s2939_s1 + $0x8] sm:$0xf] (!%p198_p2)  ;;  %vm386_vm5 = vcmask (!%p198_p2), 31744   ;;  %v2527_v15 = vsel (!%p198_p2), %vm297_vm0, %v2505_v9, 0 }
   0xa   : > { %v2531_v16 = vsel (!%p198_p2), %vm297_vm0, %v2518_v11, 0  ;;  %vm2560_vm6 = vmor (!%p198_p2), %vm484_vm3, %vm485_vm4  ;;  %vm725_vm7 = vcmask (!%p198_p2), 1042432   ;;  %vm726_vm8 = vcmask (!%p198_p2), 1046532  }
   0xb   : > { %vm2607_vm9 = vmor (!%p198_p2), %vm725_vm7, %vm726_vm8 }
   0xd   : > { %s2949_s19 = smov (!%p230_p3, %s1974_s19), 1 }
   0xe   : > { %s2397_s30 = smul.u32 80, %s2949_s19  ;;  %s2163_s6 = sshll.u32 %s2949_s19, 5 }
   0xf   : > { %s2500_s9 = scalar_lea.vmem %s2941_s3, %s2163_s6  ;;  %s2164_s27 = sshll.u32 %s2949_s19, 6 }
  0x10   : > { %s2513_s14 = scalar_lea.vmem %s2938_s0, %s2397_s30  ;;  %v2410_v31 = vld [vmem:[%s2500_s9] sm:$0xff]   ;;  %v2411_v0 = vld [vmem:[%s2500_s9 + $0x8] sm:$0xff]   ;;  %s2917_s30 = scalar_lea.vmem %s2943_s5, %s2164_s27 }
  0x11   : > { %v2406_v12 = vld [vmem:[%s2513_s14] ss:$8 sps:$4 sm:$0xff]   ;;  %v2407_v13 = vld [vmem:[%s2513_s14 + $0x10] ss:$8 sps:$4 sm:$0xff]   ;;  %v2536_v18 = vld [vmem:[%s2513_s14 + $0xc] sm:$0x1] }
  0x12   : > { %2217 = vmatprep.mubr.msk.bf16.mxu1 %vm284_vm2, %v2406_v12  ;;  %v2408_v14 = vld [vmem:[%s2513_s14 + $0x20] ss:$8 sps:$4 sm:$0xff]   ;;  %v2045_v19 = vld [vmem:[%s2513_s14 + $0x10] sm:$0xf]  ;;  %v2541_v21 = vld [vmem:[%s2513_s14 + $0x14] sm:$0x1] }
  0x13   : > { %2218 = vmatmul.mubr.msk.bf16.vlgmr.msra.gmra.mrb[0].mxu1 %vm284_vm2, %v2407_v13  ;;  %v2043_v17 = vld [vmem:[%s2513_s14 + $0x8] sm:$0xf]  ;;  %v2409_v20 = vld [vmem:[%s2513_s14 + $0x30] ss:$8 sps:$4 sm:$0xff]   ;;  %v1007_v24 = vshll.u32 %v2536_v18, 16  ;;  %v1012_v25 = vshrl.u32 %v2045_v19, 16 }
  0x14   : > { %2221 = vmatprep.mubr.msk.bf16.mxu1 %vm284_vm2, %v2408_v14  ;;  %2226 = vmatpush3.bf16.msra.mxu1 %v401_v7  ;;  %v998_v22 = vshrl.u32 %v2043_v17, 16  ;;  %v1001_v23 = vshll.u32 %v2043_v17, 16  ;;  %v1015_v26 = vshll.u32 %v2045_v19, 16  ;;  %v1021_v27 = vshll.u32 %v2541_v21, 16  ;;  %v2047_v30 = vld [vmem:[%s2513_s14 + $0x18] sm:$0xf] }
  0x15   : > { %2389 = vmatprep.subr.msk.bf16.mxu1 %vm297_vm0, %v2000_v6  ;;  %v1237_v28 = vrot.slane %v2536_v18, 5  ;;  %v1241_v29 = vrot.slane %v2541_v21, 5  ;;  %v1009_v34 = vrot.slane %v1007_v24, 5  ;;  %v1014_v35 = vrot.slane %v1012_v25, 4  ;;  %v2551_v36 = vld [vmem:[%s2513_s14 + $0x1c] sm:$0x1] }
  0x16   : > { %v1000_v32 = vrot.slane %v998_v22, 4  ;;  %v1003_v33 = vrot.slane %v1001_v23, 5  ;;  %v1017_v37 = vrot.slane %v1015_v26, 5  ;;  %v1023_v38 = vrot.slane %v1021_v27, 5  ;;  %v2049_v39 = vld [vmem:[%s2513_s14 + $0x20] sm:$0xf] }
  0x17   : > { %v2555_v40 = vld [vmem:[%s2513_s14 + $0x24] sm:$0x1]  ;;  %v1026_v42 = vshrl.u32 %v2047_v30, 16  ;;  %v1029_v43 = vshll.u32 %v2047_v30, 16  ;;  %v1035_v44 = vshll.u32 %v2551_v36, 16  ;;  %v1040_v47 = vshrl.u32 %v2049_v39, 16 }
  0x18   : > { %v1004_v41 = vor.u32 %v1003_v33, %v1000_v32  ;;  %v1018_v46 = vor.u32 %v1017_v37, %v1014_v35  ;;  %v1043_v48 = vshll.u32 %v2049_v39, 16  ;;  %v1049_v49 = vshll.u32 %v2555_v40, 16  ;;  %v2051_v54 = vld [vmem:[%s2513_s14 + $0x28] sm:$0xf]  ;;  %v2569_v59 = vld [vmem:[%s2513_s14 + $0x2c] sm:$0x1] }
  0x19   : > { %v1028_v51 = vrot.slane %v1026_v42, 4  ;;  %v1031_v52 = vrot.slane %v1029_v43, 5  ;;  %v1037_v53 = vrot.slane %v1035_v44, 5  ;;  %v1042_v56 = vrot.slane %v1040_v47, 4  ;;  %v2053_v1 = vld [vmem:[%s2513_s14 + $0x30] sm:$0xf] }
  0x1a   : > { %v1005_v50 = vrot.slane %v1004_v41, 4  ;;  %v1019_v55 = vrot.slane %v1018_v46, 4  ;;  %v1045_v57 = vrot.slane %v1043_v48, 5  ;;  %v1051_v58 = vrot.slane %v1049_v49, 5  ;;  %v2578_v2 = vld [vmem:[%s2513_s14 + $0x34] sm:$0x1] }
  0x1b   : > { %2222 = vmatmul.mubr.msk.bf16.gmra.mrb[4].mxu1 %vm284_vm2, %v2409_v20  ;;  %v1032_v61 = vor.u32 %v1031_v52, %v1028_v51  ;;  %v1245_v62 = vrot.slane %v2551_v36, 5  ;;  %v1249_v63 = vrot.slane %v2555_v40, 5  ;;  %v1054_v5 = vshrl.u32 %v2051_v54, 16  ;;  %v2055_v7 = vld [vmem:[%s2513_s14 + $0x38] sm:$0xf]  ;;  %v2412_v22 = vld [vmem:[%s2500_s9 + $0x10] sm:$0xff]  }
  0x1c   : > { %2227 = vmatprep.mubr.msk.bf16.mxu1 %vm386_vm5, %v2410_v31  ;;  %v1010_v60 = vsel %vm2560_vm6, %v1005_v50, %v1009_v34  ;;  %v1024_v3 = vsel %vm2560_vm6, %v1019_v55, %v1023_v38  ;;  %v1046_v4 = vor.u32 %v1045_v57, %v1042_v56  ;;  %v1057_v6 = vshll.u32 %v2051_v54, 16  ;;  %v2584_v12 = vld [vmem:[%s2513_s14 + $0x3c] sm:$0x1]  ;;  %v2057_v20 = vld [vmem:[%s2513_s14 + $0x40] sm:$0xf] }
  0x1d   : > { %v2060_v13 = vcombine.low %v1010_v60, %v1024_v3  ;;  %v1033_v14 = vrot.slane %v1032_v61, 4  ;;  %v1063_v17 = vshll.u32 %v2569_v59, 16  ;;  %v1068_v19 = vshrl.u32 %v2053_v1, 16  ;;  %v2590_v27 = vld [vmem:[%s2513_s14 + $0x44] sm:$0x1]  ;;  %v2413_v3 = vld [vmem:[%s2500_s9 + $0x18] sm:$0xff]  }
  0x1e   : > { %v1047_v23 = vrot.slane %v1046_v4, 4  ;;  %v1056_v24 = vrot.slane %v1054_v5, 4  ;;  %v1059_v25 = vrot.slane %v1057_v6, 5  ;;  %v1071_v26 = vshll.u32 %v2053_v1, 16  ;;  %v2068_v49 = vld [vmem:[%s2513_s14 + $0x8] sm:$0xe] }
  0x1f   : > { %2267 = vmatprep.mubr.msk.bf16.mxu0 %vm284_vm2, %v2060_v13  ;;  %v1038_v30 = vsel %vm2560_vm6, %v1033_v14, %v1037_v53  ;;  %v1065_v31 = vrot.slane %v1063_v17, 5  ;;  %v1070_v32 = vrot.slane %v1068_v19, 4  ;;  %v1077_v33 = vshll.u32 %v2578_v2, 16  ;;  %v2069_v55 = vld [vmem:[%s2513_s14 + $0x10] sm:$0xe] }
  0x20   : > { %v1052_v34 = vsel %vm2560_vm6, %v1047_v23, %v1051_v58  ;;  %v1060_v35 = vor.u32 %v1059_v25, %v1056_v24  ;;  %v1073_v37 = vrot.slane %v1071_v26, 5  ;;  %v1082_v38 = vshrl.u32 %v2055_v7, 16  ;;  %v2070_v60 = vld [vmem:[%s2513_s14 + $0x18] sm:$0xe]  ;;  %v468_v13 = vld [vmem:[%s2513_s14] sm:$0xf] }
  0x21   : > { %v2061_v39 = vcombine.low %v1038_v30, %v1052_v34  ;;  %v1079_v41 = vrot.slane %v1077_v33, 5  ;;  %v1085_v42 = vshll.u32 %v2055_v7, 16  ;;  %v1091_v43 = vshll.u32 %v2584_v12, 16  ;;  %v2650_v23 = vld [vmem:[%s2513_s14 + $0xc] sm:$0x1] }
  0x22   : > { %v1061_v44 = vrot.slane %v1060_v35, 4  ;;  %v1074_v46 = vor.u32 %v1073_v37, %v1070_v32  ;;  %v1084_v47 = vrot.slane %v1082_v38, 4  ;;  %v1096_v48 = vshrl.u32 %v2057_v20, 16  ;;  %v472_v24 = vld [vmem:[%s2513_s14 + $0x10] sm:$0xf] }
  0x23   : > { %2228 = vmatmul.mubr.msk.bf16.vlgmr.msra.gmra.mrb[0].mxu1 %vm386_vm5, %v2411_v0  ;;  %2268 = vmatmul.mubr.msk.bf16.vlgmr.msra.gmra.mrb[0].mxu0 %vm284_vm2, %v2061_v39  ;;  %v1087_v50 = vrot.slane %v1085_v42, 5  ;;  %v1093_v51 = vrot.slane %v1091_v43, 5  ;;  %v1099_v52 = vshll.u32 %v2057_v20, 16  ;;  %v1105_v53 = vshll.u32 %v2590_v27, 16  ;;  %v2634_v20 = vld [vmem:[%s2513_s14 + $0x4] sm:$0x1] }
  0x24   : > { %2231 = vmatprep.mubr.msk.bf16.mxu1 %vm386_vm5, %v2412_v22  ;;  %2236 = vmatpush3.bf16.msra.mxu1 %v2508_v10  ;;  %v1066_v10 = vsel %vm2560_vm6, %v1061_v44, %v1065_v31  ;;  %v1075_v56 = vrot.slane %v1074_v46, 4  ;;  %v1098_v57 = vrot.slane %v1096_v48, 4  ;;  %v2076_v58 = vrot.slane %v2068_v49, 9  ;;  %v470_v22 = vld [vmem:[%s2513_s14 + $0x8] sm:$0xf] }
  0x25   : > { %2390 = vmatprep.subr.msk.bf16.mxu1 %vm297_vm0, %v2518_v11  ;;  %2276 = vmatpush3.bf16.msra.mxu0 %v2495_v8  ;;  %v1088_v61 = vor.u32 %v1087_v50, %v1084_v47  ;;  %v1101_v0 = vrot.slane %v1099_v52, 5  ;;  %v1107_v1 = vrot.slane %v1105_v53, 5  ;;  %v2077_v4 = vrot.slane %v2069_v55, 9  ;;  %v2071_v8 = vld [vmem:[%s2513_s14 + $0x20] sm:$0xe] }
  0x26   : > { %2394 = vmatprep.subr.msk.bf16.mxu0 %vm297_vm0, %v2505_v9  ;;  %v1080_v11 = vsel %vm2560_vm6, %v1075_v56, %v1079_v41  ;;  %v1238_v5 = vsel %vm2607_vm9, %v2076_v58, %v1237_v28  ;;  %v2078_v6 = vrot.slane %v2070_v60, 9  ;;  %v2079_v7 = vrot.slane %v2071_v8, 9  ;;  %v474_v33 = vld [vmem:[%s2513_s14 + $0x18] sm:$0xf]  ;;  %v2668_v38 = vld [vmem:[%s2513_s14 + $0x1c] sm:$0x1] }
  0x27   : > { %v2062_v14 = vcombine.low %v1066_v10, %v1080_v11  ;;  %v1089_v17 = vrot.slane %v1088_v61, 4  ;;  %v1102_v19 = vor.u32 %v1101_v0, %v1098_v57  ;;  %v1242_v9 = vsel %vm2607_vm9, %v2077_v4, %v1241_v29  ;;  %v2072_v46 = vld [vmem:[%s2513_s14 + $0x28] sm:$0xe]  ;;  %v2073_v58 = vld [vmem:[%s2513_s14 + $0x30] sm:$0xe] }
  0x28   : > { %v2085_v18 = vcombine.low %v1238_v5, %v1242_v9  ;;  %v2641_v28 = vsel %vm2607_vm9, %v2078_v6, %v1245_v62  ;;  %v2647_v21 = vsel %vm2607_vm9, %v2079_v7, %v1249_v63  ;;  %v488_v29 = vshrl.u32 %v468_v13, 16  ;;  %v2660_v63 = vld [vmem:[%s2513_s14 + $0x14] sm:$0x1]  ;;  %v2074_v4 = vld [vmem:[%s2513_s14 + $0x38] sm:$0xe] }
  0x29   : > { %2271 = vmatprep.mubr.msk.bf16.mxu0 %vm284_vm2, %v2062_v14  ;;  %v1094_v36 = vsel %vm2560_vm6, %v1089_v17, %v1093_v51  ;;  %v1103_v25 = vrot.slane %v1102_v19, 4  ;;  %v2086_v40 = vcombine.low %v2641_v28, %v2647_v21  ;;  %v491_v62 = vshll.u32 %v468_v13, 16  ;;  %v2075_v7 = vld [vmem:[%s2513_s14 + $0x40] sm:$0xe] }
  0x2a   : > { %v490_v26 = vrot.slane %v488_v29, 4  ;;  %v497_v30 = vshll.u32 %v2634_v20, 16  ;;  %v502_v31 = vshrl.u32 %v470_v22, 16  ;;  %v505_v32 = vshll.u32 %v470_v22, 16  ;;  %v476_v9 = vld [vmem:[%s2513_s14 + $0x20] sm:$0xf] }
  0x2b   : > { %2232 = vmatmul.mubr.msk.bf16.gmra.mrb[4].mxu1 %vm386_vm5, %v2413_v3  ;;  %v1108_v34 = vsel %vm2560_vm6, %v1103_v25, %v1107_v1  ;;  %v493_v35 = vrot.slane %v491_v62, 5  ;;  %v511_v37 = vshll.u32 %v2650_v23, 16  ;;  %v516_v39 = vshrl.u32 %v472_v24, 16  ;;  %v2686_v22 = vld [vmem:[%s2513_s14 + $0x24] sm:$0x1] }
  0x2c   : > { %v2063_v41 = vcombine.low %v1094_v36, %v1108_v34  ;;  %v499_v42 = vrot.slane %v497_v30, 5  ;;  %v504_v43 = vrot.slane %v502_v31, 4  ;;  %v507_v44 = vrot.slane %v505_v32, 5  ;;  %v478_v25 = vld [vmem:[%s2513_s14 + $0x28] sm:$0xf] }
  0x2d   : > { %v494_v47 = vor.u32 %v493_v35, %v490_v26  ;;  %v513_v48 = vrot.slane %v511_v37, 5  ;;  %v518_v49 = vrot.slane %v516_v39, 4  ;;  %v519_v50 = vshll.u32 %v472_v24, 16  ;;  %v2702_v34 = vld [vmem:[%s2513_s14 + $0x2c] sm:$0x1] }
  0x2e   : > { %2272 = vmatmul.mubr.msk.bf16.gmra.mrb[4].mxu0 %vm284_vm2, %v2063_v41  ;;  %v508_v51 = vor.u32 %v507_v44, %v504_v43  ;;  %v525_v52 = vshll.u32 %v2660_v63, 16  ;;  %v530_v53 = vshrl.u32 %v474_v33, 16  ;;  %v533_v55 = vshll.u32 %v474_v33, 16  ;;  %v2719_v43 = vld [vmem:[%s2513_s14 + $0x34] sm:$0x1] }
  0x2f   : > { %2277 = vmatprep.mubr.msk.bf16.mxu0 %vm284_vm2, %v2085_v18  ;;  %v495_v10 = vrot.slane %v494_v47, 4  ;;  %v521_v56 = vrot.slane %v519_v50, 5  ;;  %v539_v57 = vshll.u32 %v2668_v38, 16  ;;  %v2080_v60 = vrot.slane %v2072_v46, 9  ;;  %v482_v44 = vld [vmem:[%s2513_s14 + $0x38] sm:$0xf] }
  0x30   : > { %v509_v61 = vrot.slane %v508_v51, 4  ;;  %v527_v0 = vrot.slane %v525_v52, 5  ;;  %v532_v1 = vrot.slane %v530_v53, 4  ;;  %v535_v3 = vrot.slane %v533_v55, 5  ;;  %v2723_v50 = vld [vmem:[%s2513_s14 + $0x3c] sm:$0x1] }
  0x31   : > { %v500_v8 = vsel %vm2560_vm6, %v495_v10, %v499_v42  ;;  %v522_v11 = vor.u32 %v521_v56, %v518_v49  ;;  %v541_v5 = vrot.slane %v539_v57, 5  ;;  %v1253_v6 = vrot.slane %v2569_v59, 5  ;;  %v2126_v59 = vld [vmem:[%s2939_s1 + $0x1c] sm:$0xf]  ;;  %v2414_v55 = vld [vmem:[%s2513_s14 + $0x10] ss:$8 sps:$4 sm:$0xff]  }
  0x32   : > { %v514_v13 = vsel %vm2560_vm6, %v509_v61, %v513_v48  ;;  %v536_v14 = vor.u32 %v535_v3, %v532_v1  ;;  %v2081_v17 = vrot.slane %v2073_v58, 9  ;;  %v1257_v19 = vrot.slane %v2578_v2, 5  ;;  %v701_v10 = vld [vmem:[%s2513_s14] sm:$0xe]  ;;  %v702_v61 = vld [vmem:[%s2513_s14 + $0x8] sm:$0xe] }
  0x33   : > { %v2001_v18 = vcombine.low %v500_v8, %v514_v13  ;;  %v523_v29 = vrot.slane %v522_v11, 4  ;;  %v1254_v24 = vsel %vm2607_vm9, %v2080_v60, %v1253_v6  ;;  %v2082_v36 = vrot.slane %v2074_v4, 9 }
  0x34   : > { %v537_v62 = vrot.slane %v536_v14, 4  ;;  %v1258_v2 = vsel %vm2607_vm9, %v2081_v17, %v1257_v19  ;;  %v1261_v26 = vrot.slane %v2584_v12, 5  ;;  %v2083_v30 = vrot.slane %v2075_v7, 9  ;;  %v703_v7 = vld [vmem:[%s2513_s14 + $0x10] sm:$0xe] }
  0x35   : > { %2237 = vmatprep.mubr.msk.bf16.mxu1 %vm284_vm2, %v2001_v18  ;;  %v528_v31 = vsel %vm2560_vm6, %v523_v29, %v527_v0  ;;  %v2087_v32 = vcombine.low %v1254_v24, %v1258_v2  ;;  %v1265_v33 = vrot.slane %v2590_v27, 5  ;;  %v544_v35 = vshrl.u32 %v476_v9, 16  ;;  %v480_v27 = vld [vmem:[%s2513_s14 + $0x30] sm:$0xf]  ;;  %v704_v2 = vld [vmem:[%s2513_s14 + $0x18] sm:$0xe] }
  0x36   : > { %2278 = vmatmul.mubr.msk.bf16.vlgmr.msra.gmra.mrb[0].mxu0 %vm284_vm2, %v2086_v40  ;;  %v542_v12 = vsel %vm2560_vm6, %v537_v62, %v541_v5  ;;  %v1262_v37 = vsel %vm2607_vm9, %v2082_v36, %v1261_v26  ;;  %v547_v39 = vshll.u32 %v476_v9, 16  ;;  %v553_v41 = vshll.u32 %v2686_v22, 16  ;;  %v2415_v26 = vld [vmem:[%s2513_s14 + $0x20] ss:$8 sps:$4 sm:$0xff]  }
  0x37   : > { %2286 = vmatpush3.bf16.msra.mxu0 %v2527_v15  ;;  %v2002_v42 = vcombine.low %v528_v31, %v542_v12  ;;  %2281 = vmatprep.mubr.msk.bf16.mxu0 %vm284_vm2, %v2087_v32  ;;  %v1266_v28 = vsel %vm2607_vm9, %v2083_v30, %v1265_v33  ;;  %v546_v21 = vrot.slane %v544_v35, 4  ;;  %v558_v40 = vshrl.u32 %v478_v25, 16  ;;  %v705_v32 = vld [vmem:[%s2513_s14 + $0x20] sm:$0xe] }
  0x38   : > { %v2088_v46 = vcombine.low %v1262_v37, %v1266_v28  ;;  %v549_v47 = vrot.slane %v547_v39, 5  ;;  %v555_v48 = vrot.slane %v553_v41, 5  ;;  %v561_v49 = vshll.u32 %v478_v25, 16  ;;  %2395 = vmatprep.subr.msk.bf16.mxu0 %vm297_vm0, %v2126_v59  ;;  %v706_v39 = vld [vmem:[%s2513_s14 + $0x28] sm:$0xe] }
  0x39   : > { %2238 = vmatmul.mubr.msk.bf16.vlgmr.msra.gmra.mrb[0].mxu1 %vm284_vm2, %v2002_v42  ;;  %v560_v15 = vrot.slane %v558_v40, 4  ;;  %v567_v51 = vshll.u32 %v2702_v34, 16  ;;  %v572_v52 = vshrl.u32 %v480_v27, 16  ;;  %v575_v53 = vshll.u32 %v480_v27, 16  ;;  %v707_v41 = vld [vmem:[%s2513_s14 + $0x30] sm:$0xe] }
  0x3a   : > { %v550_v56 = vor.u32 %v549_v47, %v546_v21  ;;  %v563_v57 = vrot.slane %v561_v49, 5  ;;  %v581_v58 = vshll.u32 %v2719_v43, 16  ;;  %v586_v60 = vshrl.u32 %v482_v44, 16  ;;  %2246 = vmatpush3.bf16.msra.mxu1 %v2531_v16  ;;  %v2034_v40 = vld [vmem:[%s2939_s1 + $0xc] sm:$0xf] }
  0x3b   : > { %v569_v0 = vrot.slane %v567_v51, 5  ;;  %v574_v1 = vrot.slane %v572_v52, 4  ;;  %v577_v3 = vrot.slane %v575_v53, 5  ;;  %v589_v4 = vshll.u32 %v482_v44, 16  ;;  %v708_v47 = vld [vmem:[%s2513_s14 + $0x38] sm:$0xe]  ;;  %2391 = vmatprep.subr.msk.bf16.mxu1 %vm297_vm0, %v2034_v40 }
  0x3c   : > { %v551_v8 = vrot.slane %v550_v56, 4  ;;  %v564_v11 = vor.u32 %v563_v57, %v560_v15  ;;  %v583_v5 = vrot.slane %v581_v58, 5  ;;  %v588_v6 = vrot.slane %v586_v60, 4  ;;  %v2774_v53 = vld [vmem:[%s2513_s14 + $0x14] sm:$0x1] }
  0x3d   : > { %v578_v13 = vor.u32 %v577_v3, %v574_v1  ;;  %v591_v14 = vrot.slane %v589_v4, 5  ;;  %v595_v17 = vshll.u32 %v2723_v50, 16  ;;  %v1643_v19 = vsel %vm297_vm0, %v2126_v59, 0  ;;  %v2781_v58 = vld [vmem:[%s2513_s14 + $0x1c] sm:$0x1] }
  0x3e   : > { %2282 = vmatmul.mubr.msk.bf16.gmra.mrb[4].mxu0 %vm284_vm2, %v2088_v46  ;;  %v556_v16 = vsel %vm2560_vm6, %v551_v8, %v555_v48  ;;  %v565_v9 = vrot.slane %v564_v11, 4  ;;  %v2009_v18 = vrot.slane %v701_v10, 9  ;;  %v730_v29 = vrot.slane %v2634_v20, 5  ;;  %v2110_v48 = vld [vmem:[%s2513_s14 + $0x10] sm:$0xf] }
  0x3f   : > { %v579_v24 = vrot.slane %v578_v13, 4  ;;  %v592_v36 = vor.u32 %v591_v14, %v588_v6  ;;  %v597_v25 = vrot.slane %v595_v17, 5  ;;  %2287 = vmatprep.mubr.msk.bf16.mxu0 %vm284_vm2, %v2414_v55  ;;  %v2010_v62 = vrot.slane %v702_v61, 9  ;;  %v2112_v55 = vld [vmem:[%s2513_s14 + $0x18] sm:$0xf] }
  0x40   : > { %v570_v59 = vsel %vm2560_vm6, %v565_v9, %v569_v0  ;;  %v731_v30 = vsel %vm2607_vm9, %v2009_v18, %v730_v29  ;;  %v734_v31 = vrot.slane %v2650_v23, 5  ;;  %v2011_v20 = vrot.slane %v703_v7, 9  ;;  %v2416_v23 = vld [vmem:[%s2513_s14 + $0x30] ss:$8 sps:$4 sm:$0xff]   ;;  %v2151_v60 = vld [vmem:[%s2939_s1 + $0x20] sm:$0xf] }
  0x41   : > { %v2003_v33 = vcombine.low %v556_v16, %v570_v59  ;;  %v584_v35 = vsel %vm2560_vm6, %v579_v24, %v583_v5  ;;  %v593_v12 = vrot.slane %v592_v36, 4  ;;  %v738_v37 = vrot.slane %v2660_v63, 5  ;;  %v2114_v1 = vld [vmem:[%s2513_s14 + $0x20] sm:$0xf]  ;;  %v2799_v5 = vld [vmem:[%s2513_s14 + $0x24] sm:$0x1] }
  0x42   : > { %v735_v27 = vsel %vm2607_vm9, %v2010_v62, %v734_v31  ;;  %v2012_v42 = vrot.slane %v704_v2, 9  ;;  %v742_v28 = vrot.slane %v2668_v38, 5  ;;  %v2013_v21 = vrot.slane %v705_v32, 9  ;;  %v2116_v6 = vld [vmem:[%s2513_s14 + $0x28] sm:$0xf] }
  0x43   : > { %2241 = vmatprep.mubr.msk.bf16.mxu1 %vm284_vm2, %v2003_v33  ;;  %v598_v63 = vsel %vm2560_vm6, %v593_v12, %v597_v25  ;;  %v2018_v44 = vcombine.low %v731_v30, %v735_v27  ;;  %v739_v46 = vsel %vm2607_vm9, %v2011_v20, %v738_v37  ;;  %v746_v38 = vrot.slane %v2686_v22, 5  ;;  %v2814_v25 = vld [vmem:[%s2513_s14 + $0x2c] sm:$0x1] }
  0x44   : > { %v2004_v49 = vcombine.low %v584_v35, %v598_v63  ;;  %v743_v15 = vsel %vm2607_vm9, %v2012_v42, %v742_v28  ;;  %v2014_v51 = vrot.slane %v706_v39, 9  ;;  %v750_v52 = vrot.slane %v2702_v34, 5 }
  0x45   : > { %v2019_v10 = vcombine.low %v739_v46, %v743_v15  ;;  %v747_v56 = vsel %vm2607_vm9, %v2013_v21, %v746_v38  ;;  %v2015_v22 = vrot.slane %v707_v41, 9  ;;  %v754_v57 = vrot.slane %v2719_v43, 5  ;;  %v2120_v46 = vld [vmem:[%s2513_s14 + $0x38] sm:$0xf] }
  0x46   : > { %2242 = vmatmul.mubr.msk.bf16.gmra.mrb[4].mxu1 %vm284_vm2, %v2004_v49  ;;  %2288 = vmatmul.mubr.msk.bf16.vlgmr.msra.gmra.mrb[0].mxu0 %vm284_vm2, %v2415_v26  ;;  %v751_v34 = vsel %vm2607_vm9, %v2014_v51, %v750_v52  ;;  %v2016_v61 = vrot.slane %v708_v47, 9  ;;  %v758_v0 = vrot.slane %v2723_v50, 5  ;;  %v1505_v43 = vshrl.u32 %v2110_v48, 16  ;;  %v2417_v50 = vld [vmem:[%s2513_s14 + $0x40] ss:$8 sps:$4 sm:$0xff]  }
  0x47   : > { %2296 = vmatpush3.bf16.msra.mxu0 %v1643_v19  ;;  %2247 = vmatprep.mubr.msk.bf16.mxu1 %vm284_vm2, %v2018_v44  ;;  %v2020_v3 = vcombine.low %v747_v56, %v751_v34  ;;  %v2795_v4 = vsel %vm2607_vm9, %v2015_v22, %v754_v57  ;;  %v1508_v8 = vshll.u32 %v2110_v48, 16  ;;  %v1514_v11 = vshll.u32 %v2774_v53, 16  ;;  %v2826_v44 = vld [vmem:[%s2513_s14 + $0x34] sm:$0x1]  ;;  %v2832_v49 = vld [vmem:[%s2513_s14 + $0x3c] sm:$0x1] }
  0x48   : > { %2291 = vmatprep.mubr.msk.bf16.mxu0 %vm284_vm2, %v2416_v23  ;;  %v2806_v7 = vsel %vm2607_vm9, %v2016_v61, %v758_v0  ;;  %v1507_v13 = vrot.slane %v1505_v43, 4  ;;  %v1519_v14 = vshrl.u32 %v2112_v55, 16  ;;  %v1522_v17 = vshll.u32 %v2112_v55, 16  ;;  %2396 = vmatprep.subr.msk.bf16.mxu0 %vm297_vm0, %v2151_v60  ;;  %v2118_v23 = vld [vmem:[%s2513_s14 + $0x30] sm:$0xf] }
  0x49   : > { %v2021_v19 = vcombine.low %v2795_v4, %v2806_v7  ;;  %v1510_v16 = vrot.slane %v1508_v8, 5  ;;  %v1516_v9 = vrot.slane %v1514_v11, 5  ;;  %v1528_v18 = vshll.u32 %v2781_v58, 16  ;;  %v2122_v52 = vld [vmem:[%s2513_s14 + $0x40] sm:$0xf] }
  0x4a   : > { %v1521_v29 = vrot.slane %v1519_v14, 4  ;;  %v1524_v24 = vrot.slane %v1522_v17, 5  ;;  %v906_v36 = vsel %vm297_vm0, %v2034_v40, 0  ;;  %v1533_v62 = vshrl.u32 %v2114_v1, 16  ;;  %v2418_v56 = vld [vmem:[%s2513_s14 + $0x8] ss:$8 sps:$4 sm:$0xff]  }
  0x4b   : > { %v1511_v2 = vor.u32 %v1510_v16, %v1507_v13  ;;  %v1530_v59 = vrot.slane %v1528_v18, 5  ;;  %v1536_v26 = vshll.u32 %v2114_v1, 16  ;;  %v1542_v30 = vshll.u32 %v2799_v5, 16  ;;  %v2124_v1 = vld [vmem:[%s2513_s14 + $0x48] sm:$0xf] }
  0x4c   : > { %v1525_v31 = vor.u32 %v1524_v24, %v1521_v29  ;;  %v1535_v20 = vrot.slane %v1533_v62, 4  ;;  %v1547_v32 = vshrl.u32 %v2116_v6, 16  ;;  %v1550_v33 = vshll.u32 %v2116_v6, 16  ;;  %v2846_v6 = vld [vmem:[%s2513_s14 + $0x4c] sm:$0x1] }
  0x4d   : > { %v1512_v35 = vrot.slane %v1511_v2, 4  ;;  %v1538_v12 = vrot.slane %v1536_v26, 5  ;;  %v1544_v37 = vrot.slane %v1542_v30, 5  ;;  %v1556_v39 = vshll.u32 %v2814_v25, 16 }
  0x4e   : > { %2248 = vmatmul.mubr.msk.bf16.vlgmr.msra.gmra.mrb[0].mxu1 %vm284_vm2, %v2019_v10  ;;  %2292 = vmatmul.mubr.msk.bf16.gmra.mrb[4].mxu0 %vm284_vm2, %v2417_v50  ;;  %v1526_v41 = vrot.slane %v1525_v31, 4  ;;  %v1549_v27 = vrot.slane %v1547_v32, 4  ;;  %v1552_v42 = vrot.slane %v1550_v33, 5  ;;  %v1801_v28 = vsel %vm297_vm0, %v2151_v60, 0  ;;  %v2838_v60 = vld [vmem:[%s2513_s14 + $0x44] sm:$0x1] }
  0x4f   : > { %2251 = vmatprep.mubr.msk.bf16.mxu1 %vm284_vm2, %v2020_v3  ;;  %v1517_v21 = vsel %vm2560_vm6, %v1512_v35, %v1516_v9  ;;  %2256 = vmatpush3.bf16.msra.mxu1 %v906_v36  ;;  %v1539_v40 = vor.u32 %v1538_v12, %v1535_v20  ;;  %v1558_v63 = vrot.slane %v1556_v39, 5  ;;  %v1561_v38 = vshrl.u32 %v2118_v23, 16  ;;  %v2135_v32 = vld [vmem:[%s2513_s14 + $0x10] sm:$0xe]  ;;  %v2136_v12 = vld [vmem:[%s2513_s14 + $0x18] sm:$0xe] }
  0x50   : > { %v1531_v47 = vsel %vm2560_vm6, %v1526_v41, %v1530_v59  ;;  %v1553_v48 = vor.u32 %v1552_v42, %v1549_v27  ;;  %v1564_v15 = vshll.u32 %v2118_v23, 16  ;;  %v1570_v51 = vshll.u32 %v2826_v44, 16  ;;  %v2419_v41 = vld [vmem:[%s2513_s14 + $0x18] ss:$8 sps:$4 sm:$0xff]   ;;  %v2420_v42 = vld [vmem:[%s2513_s14 + $0x28] ss:$8 sps:$4 sm:$0xff]  }
  0x51   : > { %v2127_v55 = vcombine.low %v1517_v21, %v1531_v47  ;;  %v1540_v10 = vrot.slane %v1539_v40, 4  ;;  %v1563_v22 = vrot.slane %v1561_v38, 4  ;;  %v1575_v57 = vshrl.u32 %v2120_v46, 16 }
  0x52   : > { %v1554_v34 = vrot.slane %v1553_v48, 4  ;;  %v1566_v61 = vrot.slane %v1564_v15, 5  ;;  %v1572_v0 = vrot.slane %v1570_v51, 5  ;;  %v1578_v43 = vshll.u32 %v2120_v46, 16  ;;  %v2138_v46 = vld [vmem:[%s2513_s14 + $0x28] sm:$0xe] }
  0x53   : > { %2297 = vmatprep.mubr.msk.bf16.mxu0 %vm284_vm2, %v2127_v55  ;;  %v1545_v3 = vsel %vm2560_vm6, %v1540_v10, %v1544_v37  ;;  %v1577_v8 = vrot.slane %v1575_v57, 4  ;;  %v1584_v11 = vshll.u32 %v2832_v49, 16  ;;  %v1589_v50 = vshrl.u32 %v2122_v52, 16  ;;  %v2140_v51 = vld [vmem:[%s2513_s14 + $0x38] sm:$0xe] }
  0x54   : > { %v1559_v13 = vsel %vm2560_vm6, %v1554_v34, %v1558_v63  ;;  %v1567_v14 = vor.u32 %v1566_v61, %v1563_v22  ;;  %v1580_v17 = vrot.slane %v1578_v43, 5  ;;  %v1592_v16 = vshll.u32 %v2122_v52, 16  ;;  %v2137_v63 = vld [vmem:[%s2513_s14 + $0x20] sm:$0xe] }
  0x55   : > { %v2128_v9 = vcombine.low %v1545_v3, %v1559_v13  ;;  %v1586_v18 = vrot.slane %v1584_v11, 5  ;;  %v1591_v29 = vrot.slane %v1589_v50, 4  ;;  %v1598_v24 = vshll.u32 %v2838_v60, 16  ;;  %v2142_v11 = vld [vmem:[%s2513_s14 + $0x48] sm:$0xe] }
  0x56   : > { %2252 = vmatmul.mubr.msk.bf16.gmra.mrb[4].mxu1 %vm284_vm2, %v2021_v19  ;;  %v1568_v36 = vrot.slane %v1567_v14, 4  ;;  %v1581_v62 = vor.u32 %v1580_v17, %v1577_v8  ;;  %v1594_v2 = vrot.slane %v1592_v16, 5  ;;  %v1603_v59 = vshrl.u32 %v2124_v1, 16  ;;  %v2141_v8 = vld [vmem:[%s2513_s14 + $0x40] sm:$0xe] }
  0x57   : > { %2298 = vmatmul.mubr.msk.bf16.vlgmr.msra.gmra.mrb[0].mxu0 %vm284_vm2, %v2128_v9  ;;  %2257 = vmatprep.mubr.msk.bf16.mxu1 %vm284_vm2, %v2418_v56  ;;  %v1606_v26 = vshll.u32 %v2124_v1, 16  ;;  %v1612_v30 = vshll.u32 %v2846_v6, 16  ;;  %v1744_v31 = vrot.slane %v2774_v53, 5  ;;  %v1600_v33 = vrot.slane %v1598_v24, 5 }
  0x58   : > { %2306 = vmatpush3.bf16.msra.mxu0 %v1801_v28  ;;  %v1573_v4 = vsel %vm2560_vm6, %v1568_v36, %v1572_v0  ;;  %v1582_v7 = vrot.slane %v1581_v62, 4  ;;  %v1595_v19 = vor.u32 %v1594_v2, %v1591_v29  ;;  %v1605_v20 = vrot.slane %v1603_v59, 4 }
  0x59   : > { %v1608_v35 = vrot.slane %v1606_v26, 5  ;;  %v2143_v37 = vrot.slane %v2135_v32, 9  ;;  %v1748_v39 = vrot.slane %v2781_v58, 5  ;;  %v2144_v28 = vrot.slane %v2136_v12, 9  ;;  %v2139_v58 = vld [vmem:[%s2513_s14 + $0x30] sm:$0xe] }
  0x5a   : > { %v1587_v53 = vsel %vm2560_vm6, %v1582_v7, %v1586_v18  ;;  %v1596_v27 = vrot.slane %v1595_v19, 4  ;;  %v1614_v40 = vrot.slane %v1612_v30, 5  ;;  %v2145_v52 = vrot.slane %v2137_v63, 9 }
  0x5b   : > { %v2129_v23 = vcombine.low %v1573_v4, %v1587_v53  ;;  %v1609_v21 = vor.u32 %v1608_v35, %v1605_v20  ;;  %v1745_v38 = vsel %vm2607_vm9, %v2143_v37, %v1744_v31  ;;  %v1749_v47 = vsel %vm2607_vm9, %v2144_v28, %v1748_v39  ;;  %v2160_v31 = vld [vmem:[%s2940_s2] ss:$0 sm:$0xff] }
  0x5c   : > { %v1601_v48 = vsel %vm2560_vm6, %v1596_v27, %v1600_v33  ;;  %v1752_v55 = vrot.slane %v2799_v5, 5  ;;  %v2146_v10 = vrot.slane %v2138_v46, 9  ;;  %v2152_v22 = vcombine.low %v1745_v38, %v1749_v47  ;;  %v2421_v5 = vld [vmem:[%s2513_s14 + $0x38] ss:$8 sps:$4 sm:$0xff]  }
  0x5d   : > { %2301 = vmatprep.mubr.msk.bf16.mxu0 %vm284_vm2, %v2129_v23  ;;  %v1610_v15 = vrot.slane %v1609_v21, 4  ;;  %v1756_v57 = vrot.slane %v2814_v25, 5  ;;  %v2147_v34 = vrot.slane %v2139_v58, 9  ;;  %v1760_v0 = vrot.slane %v2826_v44, 5 }
  0x5e   : > { %2258 = vmatmul.mubr.msk.bf16.vlgmr.msra.gmra.mrb[0].mxu1 %vm284_vm2, %v2419_v41  ;;  %v2148_v43 = vrot.slane %v2140_v51, 9  ;;  %v1764_v1 = vrot.slane %v2832_v49, 5  ;;  %v1753_v45 = vsel %vm2607_vm9, %v2145_v52, %v1752_v55  ;;  %v2149_v50 = vrot.slane %v2141_v8, 9 }
  0x5f   : > { %v1615_v56 = vsel %vm2560_vm6, %v1610_v15, %v1614_v40  ;;  %2261 = vmatprep.mubr.msk.bf16.mxu1 %vm284_vm2, %v2420_v42  ;;  %v1757_v3 = vsel %vm2607_vm9, %v2146_v10, %v1756_v57  ;;  %v1761_v25 = vsel %vm2607_vm9, %v2147_v34, %v1760_v0  ;;  %v1768_v14 = vrot.slane %v2838_v60, 5 }
  0x60   : > { %v2130_v61 = vcombine.low %v1601_v48, %v1615_v56  ;;  %v1765_v44 = vsel %vm2607_vm9, %v2148_v43, %v1764_v1  ;;  %v2153_v49 = vcombine.low %v1753_v45, %v1757_v3  ;;  %v2150_v17 = vrot.slane %v2142_v11, 9 }
  0x61   : > { %v2154_v13 = vcombine.low %v1761_v25, %v1765_v44  ;;  %v1772_v16 = vrot.slane %v2846_v6, 5  ;;  %v1769_v9 = vsel %vm2607_vm9, %v2149_v50, %v1768_v14 }
  0x62   : > { %2302 = vmatmul.mubr.msk.bf16.gmra.mrb[4].mxu0 %vm284_vm2, %v2130_v61 }
  0x63   : > { %2307 = vmatprep.mubr.msk.bf16.mxu0 %vm284_vm2, %v2152_v22  ;;  %v1773_v18 = vsel %vm2607_vm9, %v2150_v17, %v1772_v16 }
  0x64   : > { %v2155_v29 = vcombine.low %v1769_v9, %v1773_v18 }
  0x66   : > { %2262 = vmatmul.mubr.msk.bf16.gmra.mrb[4].mxu1 %vm284_vm2, %v2421_v5 }
  0x6a   : > { %2308 = vmatmul.mubr.msk.bf16.vlgmr.msra.gmra.mrb[0].mxu0 %vm284_vm2, %v2153_v49 }
  0x6b   : > { %2311 = vmatprep.mubr.msk.bf16.mxu0 %vm284_vm2, %v2154_v13 }
  0x72   : > { %2312 = vmatmul.mubr.msk.bf16.gmra.mrb[4].mxu0 %vm284_vm2, %v2155_v29 }
 0x131   : > { %v2259_v24 = vpop.f32.mrb[0].mxu1 }
 0x132   : > { %v942_v36 = vpop.f32.mrb[1].mxu1 }
 0x133   : > { %v2260_v60 = vpop.f32.mrb[2].mxu1 }
 0x134   : > { %v945_v62 = vpop.f32.mrb[3].mxu1 }
 0x139   : > { %v2263_v2 = vpop.f32.mrb[4].mxu1 }
 0x13a   : > { %v958_v6 = vpop.f32.mrb[5].mxu1 }
 0x13b   : > { %v2264_v59 = vpop.f32.mrb[6].mxu1 }
 0x13c   : > { %v961_v26 = vpop.f32.mrb[7].mxu1 }
 0x13d   : > { %v2309_v30 = vpop.f32.mrb[0].mxu0 }
 0x13e   : > { %v2315_v4 = vadd.f32 %v2309_v30, %v2259_v24  ;;  %v1837_v54 = vpop.f32.mrb[1].mxu0 }
 0x13f   : > { %v2316_v7 = vadd.f32 %v1837_v54, %v942_v36  ;;  %v2310_v19 = vpop.f32.mrb[2].mxu0 }
 0x140   : > { %v1885_v20 = vadd.f32 %v2315_v4, %v2160_v31  ;;  %v2317_v32 = vadd.f32 %v2310_v19, %v2260_v60  ;;  %v1840_v33 = vpop.f32.mrb[3].mxu0 }
 0x141   : > { %v1883_v35 = vadd.f32 %v2316_v7, %v2160_v31  ;;  %v2318_v12 = vadd.f32 %v1840_v33, %v945_v62 }
 0x142   : > { %v1893_v37 = vmax.f32 %v1885_v20, 0.0  ;;  %v1886_v39 = vadd.f32 %v2317_v32, %v2160_v31 }
 0x143   : > { %v1891_v41 = vmax.f32 %v1883_v35, 0.0  ;;  %v1884_v53 = vadd.f32 %v2318_v12, %v2160_v31 }
 0x144   : > { %1901 = vst.msk [vmem:[%s2917_s30 + $0x10] sm:$0xff] %vm284_vm2, %v1893_v37  ;;  %v1894_v27 = vmax.f32 %v1886_v39, 0.0 }
 0x145   : > { %1899 = vst.msk [vmem:[%s2917_s30] sm:$0xff] %vm284_vm2, %v1891_v41  ;;  %v1892_v42 = vmax.f32 %v1884_v53, 0.0  ;;  %v2313_v28 = vpop.f32.mrb[4].mxu0 }
 0x146   : > { %1902 = vst.msk [vmem:[%s2917_s30 + $0x18] sm:$0xff] %vm284_vm2, %v1894_v27  ;;  %v2319_v23 = vadd.f32 %v2313_v28, %v2263_v2  ;;  %v1853_v21 = vpop.f32.mrb[5].mxu0 }
 0x147   : > { %1900 = vst.msk [vmem:[%s2917_s30 + $0x8] sm:$0xff] %vm284_vm2, %v1892_v42  ;;  %v2320_v40 = vadd.f32 %v1853_v21, %v958_v6  ;;  %v2314_v63 = vpop.f32.mrb[6].mxu0 }
 0x148   : > { %v1889_v46 = vadd.f32 %v2319_v23, %v2160_v31  ;;  %v2321_v38 = vadd.f32 %v2314_v63, %v2264_v59  ;;  %v1856_v47 = vpop.f32.mrb[7].mxu0 }
 0x149   : > { %v1887_v58 = vadd.f32 %v2320_v40, %v2160_v31  ;;  %v2322_v48 = vadd.f32 %v1856_v47, %v961_v26 }
 0x14a   : > { %v1897_v15 = vmax.f32 %v1889_v46, 0.0  ;;  %v1890_v51 = vadd.f32 %v2321_v38, %v2160_v31 }
 0x14b   : > { %v1895_v52 = vmax.f32 %v1887_v58, 0.0  ;;  %v1888_v55 = vadd.f32 %v2322_v48, %v2160_v31 }
 0x14c   : > { %1905 = vst.msk [vmem:[%s2917_s30 + $0x30] sm:$0xff] %vm284_vm2, %v1897_v15  ;;  %v1898_v10 = vmax.f32 %v1890_v51, 0.0 }
 0x14d   : > { %1903 = vst.msk [vmem:[%s2917_s30 + $0x20] sm:$0xff] %vm284_vm2, %v1895_v52  ;;  %v1896_v56 = vmax.f32 %v1888_v55, 0.0 }
 0x14e   : > { %1906 = vst.msk [vmem:[%s2917_s30 + $0x38] sm:$0xff] %vm284_vm2, %v1898_v10 }
 0x14f   : > { %1904 = vst.msk [vmem:[%s2917_s30 + $0x28] sm:$0xff] %vm284_vm2, %v1896_v56 }
 0x150 PF: > { %s15_s18 = sadd.s32 1, %s2428_s18  }
 0x151   : > { %p12_p4 = scmp.ge.s32.totalorder %s15_s18, 4  }
 0x153   :  { %14 = sbr.rel (!%p12_p4) target bundleno = 1 (0x1), region = 83 }

</bundles_post_ra>
